<compile_context>
chip_gen: v7x
topology: tpu7x:2x2x1
jax: 0.10.0
libtpu: 0.0.40
codegen_flags: <defaults>
</compile_context>

<pallas_src>
import functools
import math

import jax
import jax.numpy as jnp
from jax.experimental import pallas as pl
from jax.experimental.pallas import tpu as pltpu


def _round_up(x, m):
    return ((x + m - 1) // m) * m


def llama_mlp_kernel(x_ref, wgt_ref, wut_ref, wdt_ref, o_ref, acc_ref):
    """One (row-tile, I-tile) grid step.

    x_ref   : (tm, H)   input row tile (resident across the I axis)
    wgt_ref : (H, ti)   gate_proj weight tile, pre-transposed
    wut_ref : (H, ti)   up_proj weight tile, pre-transposed
    wdt_ref : (ti, H)   down_proj weight tile, pre-transposed
    o_ref   : (tm, H)   output row tile
    acc_ref : (tm, H)   f32 accumulator scratch
    """
    k = pl.program_id(1)

    @pl.when(k == 0)
    def _():
        acc_ref[...] = jnp.zeros_like(acc_ref)

    x = x_ref[...]

    # gate_k = x @ Wg.T[:, k-block]   up_k = x @ Wu.T[:, k-block]   (MXU, f32 acc)
    gate = jnp.dot(x, wgt_ref[...], preferred_element_type=jnp.float32)
    up = jnp.dot(x, wut_ref[...], preferred_element_type=jnp.float32)

    # SiLU(gate) * up in f32 (EUP handles the logistic; VPU the muls).
    hidden = (gate * jax.nn.sigmoid(gate)) * up

    # Partial down-projection, accumulated over I tiles.
    acc_ref[...] += jnp.dot(
        hidden.astype(wdt_ref.dtype), wdt_ref[...],
        preferred_element_type=jnp.float32,
    )

    @pl.when(k == pl.num_programs(1) - 1)
    def _():
        o_ref[...] = acc_ref[...].astype(o_ref.dtype)


@functools.partial(jax.jit, static_argnames=("tm", "ti"))
def llama_mlp(x, w_gate, w_up, w_down, *, tm=256, ti=512):
    """Fused LlamaMLP forward.

    x       : [M, H]
    w_gate  : [I, H]   (PyTorch [out_features, in_features] convention)
    w_up    : [I, H]
    w_down  : [H, I]
    returns : [M, H]
    """
    M, H = x.shape
    I = w_gate.shape[0]

    # --- tile-size hygiene -------------------------------------------------
    # ti: lane-dim tile over I, must be a multiple of 128.
    ti = max(128, _round_up(ti, 128))
    ti = min(ti, _round_up(I, 128))
    # tm: sublane-dim row tile, multiple of 8; shrink for tiny batches.
    tm = max(8, (tm // 8) * 8)
    if M < tm:
        tm = _round_up(M, 8)

    # --- padding -----------------------------------------------------------
    # Pad the intermediate dim so ti always divides it (zero columns are
    # numerically inert: SiLU(0)*0 == 0). Pad rows to a multiple of tm.
    Ip = _round_up(I, ti)
    Mp = _round_up(M, tm)

    # Pre-transpose once (amortized across row tiles) so each matmul
    # contracts the rhs sublane axis: x[M,H] @ [H,ti] and hidden[M,ti] @ [ti,H].
    wg_t = w_gate.T  # [H, I]
    wu_t = w_up.T    # [H, I]
    wd_t = w_down.T  # [I, H]
    if Ip != I:
        wg_t = jnp.pad(wg_t, ((0, 0), (0, Ip - I)))
        wu_t = jnp.pad(wu_t, ((0, 0), (0, Ip - I)))
        wd_t = jnp.pad(wd_t, ((0, Ip - I), (0, 0)))
    x_in = jnp.pad(x, ((0, Mp - M), (0, 0))) if Mp != M else x

    grid = (Mp // tm, Ip // ti)
    itemsize = jnp.dtype(x.dtype).itemsize

    # Rough VMEM budget: double-buffered input/weight/output tiles + f32 acc.
    vmem_est = (
        2 * tm * H * itemsize            # x tile (double-buffered)
        + 2 * 2 * H * ti * itemsize      # gate + up weight tiles
        + 2 * ti * H * itemsize          # down weight tile
        + 2 * tm * H * itemsize          # output tile
        + tm * H * 4                     # f32 accumulator scratch
        + (4 << 20)                      # headroom
    )
    vmem_limit = int(min(max(vmem_est, 32 << 20), 64 << 20))

    cost = pl.CostEstimate(
        flops=6 * Mp * H * Ip,           # three [*,H]x[H,I]-sized matmuls
        transcendentals=Mp * Ip,         # sigmoid
        bytes_accessed=(2 * Mp * H + 3 * H * Ip) * itemsize,
    )

    out = pl.pallas_call(
        llama_mlp_kernel,
        out_shape=jax.ShapeDtypeStruct((Mp, H), x.dtype),
        grid_spec=pltpu.PrefetchScalarGridSpec(
            num_scalar_prefetch=0,
            grid=grid,
            in_specs=[
                pl.BlockSpec((tm, H), lambda i, k: (i, 0)),   # x row tile
                pl.BlockSpec((H, ti), lambda i, k: (0, k)),   # gate W.T tile
                pl.BlockSpec((H, ti), lambda i, k: (0, k)),   # up   W.T tile
                pl.BlockSpec((ti, H), lambda i, k: (k, 0)),   # down W.T tile
            ],
            out_specs=pl.BlockSpec((tm, H), lambda i, k: (i, 0)),
            scratch_shapes=[pltpu.VMEM((tm, H), jnp.float32)],
        ),
        compiler_params=pltpu.CompilerParams(
            dimension_semantics=("parallel", "arbitrary"),
            vmem_limit_bytes=vmem_limit,
        ),
        cost_estimate=cost,
    )(x_in, wg_t, wu_t, wd_t)

    return out[:M] if Mp != M else out


def kaiming_uniform(key, out_features, in_features, a=math.sqrt(5)):
    """Deterministic analogue of torch.nn.init.kaiming_uniform_(a=sqrt(5))."""
    gain = math.sqrt(2.0 / (1.0 + a * a))
    bound = gain * math.sqrt(3.0 / in_features)
    return jax.random.uniform(
        key, (out_features, in_features), dtype=jnp.float32,
        minval=-bound, maxval=bound,
    )


def llama_mlp_ref(x, w_gate, w_up, w_down):
    gate = x @ w_gate.T
    up = x @ w_up.T
    hidden = jax.nn.silu(gate) * up
    return hidden @ w_down.T


if __name__ == "__main__":
    key = jax.random.PRNGKey(0)
    kx, kg, ku, kd = jax.random.split(key, 4)

    # --- Test 1: aligned small shapes, f32, tight tolerance ----------------
    M, H, I = 256, 256, 1024
    x = jax.random.normal(kx, (M, H), dtype=jnp.float32)
    w_gate = kaiming_uniform(kg, I, H)
    w_up = kaiming_uniform(ku, I, H)
    w_down = kaiming_uniform(kd, H, I)

    ref = llama_mlp_ref(x, w_gate, w_up, w_down)
    out_f32 = jax.block_until_ready(llama_mlp(x, w_gate, w_up, w_down, tm=128, ti=256))
    assert out_f32.shape == (M, H)
    assert jnp.allclose(out_f32, ref, atol=1e-3, rtol=1e-3), "f32 mismatch vs reference"

    # --- Test 2: ragged shapes (same 2:5 ratio as hidden=2000/inter=5000) --
    M2, H2, I2 = 100, 200, 500
    kx2, kg2, ku2, kd2 = jax.random.split(jax.random.PRNGKey(1), 4)
    x2 = jax.random.normal(kx2, (M2, H2), dtype=jnp.float32)
    wg2 = kaiming_uniform(kg2, I2, H2)
    wu2 = kaiming_uniform(ku2, I2, H2)
    wd2 = kaiming_uniform(kd2, H2, I2)
    ref2 = llama_mlp_ref(x2, wg2, wu2, wd2)
    out2 = jax.block_until_ready(llama_mlp(x2, wg2, wu2, wd2, tm=64, ti=256))
    assert out2.shape == (M2, H2)
    assert jnp.allclose(out2, ref2, atol=1e-3, rtol=1e-3), "ragged f32 mismatch vs reference"

    # --- Test 3: bf16 weight-streaming path (production config) ------------
    out_bf16 = jax.block_until_ready(
        llama_mlp(
            x.astype(jnp.bfloat16),
            w_gate.astype(jnp.bfloat16),
            w_up.astype(jnp.bfloat16),
            w_down.astype(jnp.bfloat16),
            tm=128, ti=256,
        )
    )
    assert out_bf16.shape == (M, H)
    assert jnp.allclose(out_bf16.astype(jnp.float32), ref, atol=1e-1, rtol=1e-1), \
        "bf16 mismatch vs reference"

    print("KERNEL_OK")
</pallas_src>

<mosaic_0001>
module attributes {stable_mosaic.version = 11 : i64} {
  func.func @llama_mlp_kernel(%arg0: i32, %arg1: i32, %arg2: memref<128x256xf32, #tpu.memory_space<vmem>>, %arg3: memref<256x256xf32, #tpu.memory_space<vmem>>, %arg4: memref<256x256xf32, #tpu.memory_space<vmem>>, %arg5: memref<256x256xf32, #tpu.memory_space<vmem>>, %arg6: memref<128x256xf32, #tpu.memory_space<vmem>>, %arg7: memref<128x256xf32, #tpu.memory_space<vmem>>) attributes {dimension_semantics = [#tpu.dimension_semantics<parallel>, #tpu.dimension_semantics<arbitrary>], iteration_bounds = array<i64: 2, 4>, scalar_prefetch = 0 : i64, scratch_operands = 1 : i64, tpu.core_type = #tpu.core_type<tc>, window_params = [{transform_indices = @transform_0, window_bounds = array<i64: 128, 256>}, {transform_indices = @transform_1, window_bounds = array<i64: 256, 256>}, {transform_indices = @transform_2, window_bounds = array<i64: 256, 256>}, {transform_indices = @transform_3, window_bounds = array<i64: 256, 256>}, {transform_indices = @transform_4, window_bounds = array<i64: 128, 256>}]} {
    %c0_i32 = arith.constant 0 : i32
    %0 = arith.cmpi eq, %arg1, %c0_i32 : i32
    %1 = arith.extui %0 : i1 to i32
    %c0_i32_0 = arith.constant 0 : i32
    %2 = arith.cmpi ne, %1, %c0_i32_0 : i32
    scf.if %2 {
      %cst_16 = arith.constant 0.000000e+00 : f32
      %23 = vector.broadcast %cst_16 : f32 to vector<128x256xf32>
      %c0_17 = arith.constant 0 : index
      %c0_18 = arith.constant 0 : index
      %24 = vector.load %arg7[%c0_17, %c0_18] : memref<128x256xf32, #tpu.memory_space<vmem>>, vector<128x256xf32>
      tpu.vector_store %arg7[%c0_17, %c0_18], %23 {strides = array<i32>} : memref<128x256xf32, #tpu.memory_space<vmem>>, vector<128x256xf32>,
    } else {
    }
    %c0 = arith.constant 0 : index
    %c0_1 = arith.constant 0 : index
    %3 = vector.load %arg2[%c0, %c0_1] : memref<128x256xf32, #tpu.memory_space<vmem>>, vector<128x256xf32>
    %c0_2 = arith.constant 0 : index
    %c0_3 = arith.constant 0 : index
    %4 = vector.load %arg3[%c0_2, %c0_3] : memref<256x256xf32, #tpu.memory_space<vmem>>, vector<256x256xf32>
    %cst = arith.constant dense<0.000000e+00> : vector<128x256xf32>
    %5 = tpu.matmul %3, %4, %cst {dimension_numbers = #tpu.dot_dimension_numbers<[1], [0], [0], [1], [0, 0, 1, 1], [], []>} : vector<128x256xf32>, vector<256x256xf32>, vector<128x256xf32> -> vector<128x256xf32>
    %c0_4 = arith.constant 0 : index
    %c0_5 = arith.constant 0 : index
    %6 = vector.load %arg4[%c0_4, %c0_5] : memref<256x256xf32, #tpu.memory_space<vmem>>, vector<256x256xf32>
    %cst_6 = arith.constant dense<0.000000e+00> : vector<128x256xf32>
    %7 = tpu.matmul %3, %6, %cst_6 {dimension_numbers = #tpu.dot_dimension_numbers<[1], [0], [0], [1], [0, 0, 1, 1], [], []>} : vector<128x256xf32>, vector<256x256xf32>, vector<128x256xf32> -> vector<128x256xf32>
    %8 = arith.negf %5 : vector<128x256xf32>
    %9 = math.exp %8 : vector<128x256xf32>
    %cst_7 = arith.constant 1.000000e+00 : f32
    %10 = vector.broadcast %cst_7 : f32 to vector<128x256xf32>
    %11 = arith.addf %10, %9 : vector<128x256xf32>
    %12 = arith.divf %10, %11 : vector<128x256xf32>
    %13 = arith.mulf %5, %12 : vector<128x256xf32>
    %14 = arith.mulf %13, %7 : vector<128x256xf32>
    %c0_8 = arith.constant 0 : index
    %c0_9 = arith.constant 0 : index
    %15 = vector.load %arg7[%c0_8, %c0_9] : memref<128x256xf32, #tpu.memory_space<vmem>>, vector<128x256xf32>
    %c0_10 = arith.constant 0 : index
    %c0_11 = arith.constant 0 : index
    %16 = vector.load %arg5[%c0_10, %c0_11] : memref<256x256xf32, #tpu.memory_space<vmem>>, vector<256x256xf32>
    %cst_12 = arith.constant dense<0.000000e+00> : vector<128x256xf32>
    %17 = tpu.matmul %14, %16, %cst_12 {dimension_numbers = #tpu.dot_dimension_numbers<[1], [0], [0], [1], [0, 0, 1, 1], [], []>} : vector<128x256xf32>, vector<256x256xf32>, vector<128x256xf32> -> vector<128x256xf32>
    %18 = arith.addf %15, %17 : vector<128x256xf32>
    %c0_13 = arith.constant 0 : index
    %c0_14 = arith.constant 0 : index
    %19 = vector.load %arg7[%c0_13, %c0_14] : memref<128x256xf32, #tpu.memory_space<vmem>>, vector<128x256xf32>
    tpu.vector_store %arg7[%c0_13, %c0_14], %18 {strides = array<i32>} : memref<128x256xf32, #tpu.memory_space<vmem>>, vector<128x256xf32>,
    %c3_i32 = arith.constant 3 : i32
    %20 = arith.cmpi eq, %arg1, %c3_i32 : i32
    %21 = arith.extui %20 : i1 to i32
    %c0_i32_15 = arith.constant 0 : i32
    %22 = arith.cmpi ne, %21, %c0_i32_15 : i32
    scf.if %22 {
      %c0_16 = arith.constant 0 : index
      %c0_17 = arith.constant 0 : index
      %23 = vector.load %arg7[%c0_16, %c0_17] : memref<128x256xf32, #tpu.memory_space<vmem>>, vector<128x256xf32>
      %c0_18 = arith.constant 0 : index
      %c0_19 = arith.constant 0 : index
      %24 = vector.load %arg6[%c0_18, %c0_19] : memref<128x256xf32, #tpu.memory_space<vmem>>, vector<128x256xf32>
      tpu.vector_store %arg6[%c0_18, %c0_19], %23 {strides = array<i32>} : memref<128x256xf32, #tpu.memory_space<vmem>>, vector<128x256xf32>,
    } else {
    }
    return
  }
  func.func @transform_0(%arg0: i32, %arg1: i32) -> (i32, i32) {
    %c0_i32 = arith.constant 0 : i32
    %c0_i32_0 = arith.constant 0 : i32
    return %arg0, %c0_i32 : i32, i32
  }
  func.func @transform_1(%arg0: i32, %arg1: i32) -> (i32, i32) {
    %c0_i32 = arith.constant 0 : i32
    %c0_i32_0 = arith.constant 0 : i32
    return %c0_i32, %arg1 : i32, i32
  }
  func.func @transform_2(%arg0: i32, %arg1: i32) -> (i32, i32) {
    %c0_i32 = arith.constant 0 : i32
    %c0_i32_0 = arith.constant 0 : i32
    return %c0_i32, %arg1 : i32, i32
  }
  func.func @transform_3(%arg0: i32, %arg1: i32) -> (i32, i32) {
    %c0_i32 = arith.constant 0 : i32
    %c0_i32_0 = arith.constant 0 : i32
    return %arg1, %c0_i32 : i32, i32
  }
  func.func @transform_4(%arg0: i32, %arg1: i32) -> (i32, i32) {
    %c0_i32 = arith.constant 0 : i32
    %c0_i32_0 = arith.constant 0 : i32
    return %arg0, %c0_i32 : i32, i32
  }
}

</mosaic_0001>

<bundles_post_ra>
// kernel: llama_mlp.1
= control target key start
LH: loop header
LB: loop body
LE: loop exit
PB: predicated region body
PF: predicated region fallthrough
CT: control target
= control target key end

     0   :  { %s3453_s0 = inlined_call_operand.vmem [shape: f32[256,256], index: 0, kind: input, shape index: {}]   ;;  %s3454_s1 = inlined_call_operand.vmem [shape: f32[256,1024], index: 1, kind: input, shape index: {}]   ;;  %s3455_s2 = inlined_call_operand.vmem [shape: f32[256,1024], index: 2, kind: input, shape index: {}]   ;;  %s3456_s3 = inlined_call_operand.vmem [shape: f32[1024,256], index: 3, kind: input, shape index: {}]   ;;  %s3457_s4 = inlined_call_operand.hbm [shape: f32[256,256], index: 4, kind: output, shape index: {}]  }
   0x1   :  { %3461 = sst [smem:[#allocation10_spill]] %s3454_s1 }
   0x2   :  { %3462 = sst [smem:[#allocation11_spill]] %s3455_s2 }
   0x3   :  { %9 = vsyncpa [#allocation6], 0 }
   0x4   :  { %11 = vsyncpa [#allocation6 + $0x1], 0  ;;  %s2521_s15 = smov 0   ;;  %s2523_s16 = smov 0  }
   0x5   :  { %s2525_s17 = smov 0   ;;  %s2527_s18 = smov 0  }
   0x6   :  { %s2529_s19 = smov 0   ;;  %s2531_s20 = smov 0  }
   0x7   :  { %s2533_s21 = smov 0   ;;  %s2535_s22 = smov 0  }
   0x8   :  { %s2537_s23 = smov 0   ;;  %s2539_s24 = smov 0  }
   0x9 LB: > { %s1872_s25 = sadd.s32 4294967295, %s2490_s24   ;;  %s1873_s26 = sadd.s32 4294967294, %s2490_s24   ;;  %s2490_s24 = sphi %s2539_s24, %s17_s24   ;;  %s2486_s23 = sphi %s2537_s23, %s3481_s23   ;;  %s2482_s22 = sphi %s2535_s22, %s3480_s22   ;;  %s2478_s21 = sphi %s2533_s21, %s3479_s21   ;;  %s2474_s20 = sphi %s2531_s20, %s3478_s20   ;;  %s2470_s19 = sphi %s2529_s19, %s3477_s19   ;;  %s2466_s18 = sphi %s2527_s18, %s3476_s18   ;;  %s2462_s17 = sphi %s2525_s17, %s3475_s17   ;;  %s2458_s16 = sphi %s2523_s16, %s3474_s16   ;;  %s2454_s15 = sphi %s2521_s15, %s3473_s15  }
   0xa   : > { %s26_s27 = sadd.s32 1, %s2482_s22  ;;  %s29_s28 = sadd.s32 1, %s2486_s23 }
   0xb   : > { %p27_p0 = scmp.ge.s32.totalorder %s26_s27, 4  ;;  %s62_s29 = sadd.s32 1, %s2470_s19 }
   0xc   : > { %p69_p1 = scmp.ne.s32.totalorder %s2470_s19, %s2466_s18  ;;  %p70_p2 = scmp.eq.s32.totalorder %s2490_s24, 0 }
   0xd   : > { %s3483_s27 = smov (%p27_p0, %s26_s27), 0  ;;  %s3485_s28 = smov (!%p27_p0, %s29_s28), %s2486_s23 }
   0xe   : > { %3463 = sst [smem:[#allocation8_spill]] %s3483_s27  ;;  %s59_s30 = ssub.s32 %s2482_s22, %s3483_s27 }
   0xf   : > { %p2584_p3 = por %p70_p2, %p69_p1  ;;  %p31_p4 = scmp.ge.s32.totalorder %s3485_s28, 2 }
  0x10   : > { %p60_p5 = scmp.eq.s32.totalorder %s59_s30, 0  ;;  %s140_s6 = sadd.s32 1, %s2462_s17 }
  0x11   : > { %p150_p6 = scmp.ne.s32.totalorder %s2462_s17, %s2458_s16  ;;  %s3487_s28 = smov (%p31_p4, %s3485_s28), 0 }
  0x12   : > { %3465 = sst [smem:[#allocation9_spill]] %s3487_s28  ;;  %s137_s8 = ssub.s32 %s2486_s23, %s3487_s28 }
  0x13   : > { %s2594_s7 = scalar_select %p60_p5, %s2470_s19, %s62_s29  }
  0x14   : > { %p151_p7 = scmp.eq.s32.totalorder %s1872_s25, 7  ;;  %p138_p8 = scmp.eq.s32.totalorder %s137_s8, 0 }
  0x15   : > { %p156_p9 = scmp.ne.s32.totalorder %s2458_s16, %s2454_s15  ;;  %p157_p11 = scmp.eq.s32.totalorder %s1873_s26, 7 }
  0x16   : > { %p2600_p10 = por %p151_p7, %p150_p6  ;;  %p1875_p13 = scmp.ge.s32.totalorder %s2490_s24, 8 }
  0x17   : > { %s2605_s10 = scalar_select %p138_p8, %s2462_s17, %s140_s6  }
  0x18   : > { %p2607_p12 = por %p157_p11, %p156_p9  ;;  %173 = sbr.rel (%p1875_p13) target bundleno = 115 (0x73), region = 16 }
  0x1f   : > { %186 = sbr.rel (!%p2584_p3) target bundleno = 73 (0x49), region = 24  ;;  %s188_s12 = sand.u32 (%p2584_p3), 1, %s2470_s19  }
  0x20   : > { %s1932_s13 = sshll.u32 (%p2584_p3), %s2482_s22, 4  ;;  %s1876_s14 = sshll.u32 (%p2584_p3), %s188_s12, 9 }
  0x21   : > { %s3468_s1 = sld [smem:[#allocation10_spill]] (%p2584_p3)  ;;  %s2624_s30 = scalar_lea.vmem (%p2584_p3), [#allocation3], %s1876_s14 }
  0x27   : > { %s2619_s26 = scalar_lea.vmem %s3468_s1, %s1932_s13 }
  0x28   : > { %v206_v0 = vld [vmem:[%s2619_s26] sm:$0xff]  ;;  %v208_v1 = vld [vmem:[%s2619_s26 + $0x8] sm:$0xff] }
  0x29   : > { %v210_v2 = vld [vmem:[%s2619_s26 + $0x40] sm:$0xff]  ;;  %207 = vst [vmem:[%s2624_s30] sm:$0xff] %v206_v0  ;;  %209 = vst [vmem:[%s2624_s30 + $0x8] sm:$0xff] %v208_v1  ;;  %v212_v3 = vld [vmem:[%s2619_s26 + $0x48] sm:$0xff] }
  0x2a   : > { %211 = vst [vmem:[%s2624_s30 + $0x10] sm:$0xff] %v210_v2  ;;  %v214_v4 = vld [vmem:[%s2619_s26 + $0x80] sm:$0xff]  ;;  %v216_v5 = vld [vmem:[%s2619_s26 + $0x88] sm:$0xff]  ;;  %213 = vst [vmem:[%s2624_s30 + $0x18] sm:$0xff] %v212_v3 }
  0x2b   : > { %215 = vst [vmem:[%s2624_s30 + $0x20] sm:$0xff] %v214_v4  ;;  %217 = vst [vmem:[%s2624_s30 + $0x28] sm:$0xff] %v216_v5  ;;  %v218_v6 = vld [vmem:[%s2619_s26 + $0xc0] sm:$0xff]  ;;  %v220_v7 = vld [vmem:[%s2619_s26 + $0xc8] sm:$0xff] }
  0x2c   : > { %v222_v8 = vld [vmem:[%s2619_s26 + $0x100] sm:$0xff]  ;;  %219 = vst [vmem:[%s2624_s30 + $0x30] sm:$0xff] %v218_v6  ;;  %221 = vst [vmem:[%s2624_s30 + $0x38] sm:$0xff] %v220_v7  ;;  %v224_v9 = vld [vmem:[%s2619_s26 + $0x108] sm:$0xff] }
  0x2d   : > { %223 = vst [vmem:[%s2624_s30 + $0x40] sm:$0xff] %v222_v8  ;;  %v226_v10 = vld [vmem:[%s2619_s26 + $0x140] sm:$0xff]  ;;  %v228_v11 = vld [vmem:[%s2619_s26 + $0x148] sm:$0xff]  ;;  %225 = vst [vmem:[%s2624_s30 + $0x48] sm:$0xff] %v224_v9 }
  0x2e   : > { %227 = vst [vmem:[%s2624_s30 + $0x50] sm:$0xff] %v226_v10  ;;  %229 = vst [vmem:[%s2624_s30 + $0x58] sm:$0xff] %v228_v11  ;;  %v230_v12 = vld [vmem:[%s2619_s26 + $0x180] sm:$0xff]  ;;  %v232_v13 = vld [vmem:[%s2619_s26 + $0x188] sm:$0xff] }
  0x2f   : > { %v234_v14 = vld [vmem:[%s2619_s26 + $0x1c0] sm:$0xff]  ;;  %231 = vst [vmem:[%s2624_s30 + $0x60] sm:$0xff] %v230_v12  ;;  %233 = vst [vmem:[%s2624_s30 + $0x68] sm:$0xff] %v232_v13  ;;  %v236_v15 = vld [vmem:[%s2619_s26 + $0x1c8] sm:$0xff] }
  0x30   : > { %235 = vst [vmem:[%s2624_s30 + $0x70] sm:$0xff] %v234_v14  ;;  %v238_v16 = vld [vmem:[%s2619_s26 + $0x200] sm:$0xff]  ;;  %v240_v17 = vld [vmem:[%s2619_s26 + $0x208] sm:$0xff]  ;;  %237 = vst [vmem:[%s2624_s30 + $0x78] sm:$0xff] %v236_v15 }
  0x31   : > { %239 = vst [vmem:[%s2624_s30 + $0x80] sm:$0xff] %v238_v16  ;;  %241 = vst [vmem:[%s2624_s30 + $0x88] sm:$0xff] %v240_v17  ;;  %v242_v18 = vld [vmem:[%s2619_s26 + $0x240] sm:$0xff]  ;;  %v244_v19 = vld [vmem:[%s2619_s26 + $0x248] sm:$0xff] }
  0x32   : > { %v246_v20 = vld [vmem:[%s2619_s26 + $0x280] sm:$0xff]  ;;  %243 = vst [vmem:[%s2624_s30 + $0x90] sm:$0xff] %v242_v18  ;;  %245 = vst [vmem:[%s2624_s30 + $0x98] sm:$0xff] %v244_v19  ;;  %v248_v21 = vld [vmem:[%s2619_s26 + $0x288] sm:$0xff] }
  0x33   : > { %247 = vst [vmem:[%s2624_s30 + $0xa0] sm:$0xff] %v246_v20  ;;  %v250_v22 = vld [vmem:[%s2619_s26 + $0x2c0] sm:$0xff]  ;;  %v252_v23 = vld [vmem:[%s2619_s26 + $0x2c8] sm:$0xff]  ;;  %249 = vst [vmem:[%s2624_s30 + $0xa8] sm:$0xff] %v248_v21 }
  0x34   : > { %251 = vst [vmem:[%s2624_s30 + $0xb0] sm:$0xff] %v250_v22  ;;  %253 = vst [vmem:[%s2624_s30 + $0xb8] sm:$0xff] %v252_v23  ;;  %v254_v24 = vld [vmem:[%s2619_s26 + $0x300] sm:$0xff]  ;;  %v256_v25 = vld [vmem:[%s2619_s26 + $0x308] sm:$0xff] }
  0x35   : > { %v258_v26 = vld [vmem:[%s2619_s26 + $0x340] sm:$0xff]  ;;  %255 = vst [vmem:[%s2624_s30 + $0xc0] sm:$0xff] %v254_v24  ;;  %257 = vst [vmem:[%s2624_s30 + $0xc8] sm:$0xff] %v256_v25  ;;  %v260_v27 = vld [vmem:[%s2619_s26 + $0x348] sm:$0xff] }
  0x36   : > { %259 = vst [vmem:[%s2624_s30 + $0xd0] sm:$0xff] %v258_v26  ;;  %v262_v28 = vld [vmem:[%s2619_s26 + $0x380] sm:$0xff]  ;;  %v264_v29 = vld [vmem:[%s2619_s26 + $0x388] sm:$0xff]  ;;  %261 = vst [vmem:[%s2624_s30 + $0xd8] sm:$0xff] %v260_v27 }
  0x37   : > { %263 = vst [vmem:[%s2624_s30 + $0xe0] sm:$0xff] %v262_v28  ;;  %265 = vst [vmem:[%s2624_s30 + $0xe8] sm:$0xff] %v264_v29  ;;  %v266_v30 = vld [vmem:[%s2619_s26 + $0x3c0] sm:$0xff]  ;;  %v268_v31 = vld [vmem:[%s2619_s26 + $0x3c8] sm:$0xff] }
  0x38   : > { %v270_v32 = vld [vmem:[%s2619_s26 + $0x400] sm:$0xff]  ;;  %267 = vst [vmem:[%s2624_s30 + $0xf0] sm:$0xff] %v266_v30  ;;  %269 = vst [vmem:[%s2624_s30 + $0xf8] sm:$0xff] %v268_v31  ;;  %v272_v33 = vld [vmem:[%s2619_s26 + $0x408] sm:$0xff] }
  0x39   : > { %271 = vst [vmem:[%s2624_s30 + $0x100] sm:$0xff] %v270_v32  ;;  %v274_v34 = vld [vmem:[%s2619_s26 + $0x440] sm:$0xff]  ;;  %v276_v35 = vld [vmem:[%s2619_s26 + $0x448] sm:$0xff]  ;;  %273 = vst [vmem:[%s2624_s30 + $0x108] sm:$0xff] %v272_v33 }
  0x3a   : > { %275 = vst [vmem:[%s2624_s30 + $0x110] sm:$0xff] %v274_v34  ;;  %277 = vst [vmem:[%s2624_s30 + $0x118] sm:$0xff] %v276_v35  ;;  %v278_v36 = vld [vmem:[%s2619_s26 + $0x480] sm:$0xff]  ;;  %v280_v37 = vld [vmem:[%s2619_s26 + $0x488] sm:$0xff] }
  0x3b   : > { %v282_v38 = vld [vmem:[%s2619_s26 + $0x4c0] sm:$0xff]  ;;  %279 = vst [vmem:[%s2624_s30 + $0x120] sm:$0xff] %v278_v36  ;;  %281 = vst [vmem:[%s2624_s30 + $0x128] sm:$0xff] %v280_v37  ;;  %v284_v39 = vld [vmem:[%s2619_s26 + $0x4c8] sm:$0xff] }
  0x3c   : > { %283 = vst [vmem:[%s2624_s30 + $0x130] sm:$0xff] %v282_v38  ;;  %v286_v40 = vld [vmem:[%s2619_s26 + $0x500] sm:$0xff]  ;;  %v288_v41 = vld [vmem:[%s2619_s26 + $0x508] sm:$0xff]  ;;  %285 = vst [vmem:[%s2624_s30 + $0x138] sm:$0xff] %v284_v39 }
  0x3d   : > { %287 = vst [vmem:[%s2624_s30 + $0x140] sm:$0xff] %v286_v40  ;;  %289 = vst [vmem:[%s2624_s30 + $0x148] sm:$0xff] %v288_v41  ;;  %v290_v42 = vld [vmem:[%s2619_s26 + $0x540] sm:$0xff]  ;;  %v292_v43 = vld [vmem:[%s2619_s26 + $0x548] sm:$0xff] }
  0x3e   : > { %v294_v44 = vld [vmem:[%s2619_s26 + $0x580] sm:$0xff]  ;;  %291 = vst [vmem:[%s2624_s30 + $0x150] sm:$0xff] %v290_v42  ;;  %293 = vst [vmem:[%s2624_s30 + $0x158] sm:$0xff] %v292_v43  ;;  %v296_v45 = vld [vmem:[%s2619_s26 + $0x588] sm:$0xff] }
  0x3f   : > { %295 = vst [vmem:[%s2624_s30 + $0x160] sm:$0xff] %v294_v44  ;;  %v298_v46 = vld [vmem:[%s2619_s26 + $0x5c0] sm:$0xff]  ;;  %v300_v47 = vld [vmem:[%s2619_s26 + $0x5c8] sm:$0xff]  ;;  %297 = vst [vmem:[%s2624_s30 + $0x168] sm:$0xff] %v296_v45 }
  0x40   : > { %299 = vst [vmem:[%s2624_s30 + $0x170] sm:$0xff] %v298_v46  ;;  %301 = vst [vmem:[%s2624_s30 + $0x178] sm:$0xff] %v300_v47  ;;  %v302_v48 = vld [vmem:[%s2619_s26 + $0x600] sm:$0xff]  ;;  %v304_v49 = vld [vmem:[%s2619_s26 + $0x608] sm:$0xff] }
  0x41   : > { %v306_v50 = vld [vmem:[%s2619_s26 + $0x640] sm:$0xff]  ;;  %303 = vst [vmem:[%s2624_s30 + $0x180] sm:$0xff] %v302_v48  ;;  %305 = vst [vmem:[%s2624_s30 + $0x188] sm:$0xff] %v304_v49  ;;  %v308_v51 = vld [vmem:[%s2619_s26 + $0x648] sm:$0xff] }
  0x42   : > { %307 = vst [vmem:[%s2624_s30 + $0x190] sm:$0xff] %v306_v50  ;;  %v310_v52 = vld [vmem:[%s2619_s26 + $0x680] sm:$0xff]  ;;  %v312_v53 = vld [vmem:[%s2619_s26 + $0x688] sm:$0xff]  ;;  %309 = vst [vmem:[%s2624_s30 + $0x198] sm:$0xff] %v308_v51 }
  0x43   : > { %311 = vst [vmem:[%s2624_s30 + $0x1a0] sm:$0xff] %v310_v52  ;;  %313 = vst [vmem:[%s2624_s30 + $0x1a8] sm:$0xff] %v312_v53  ;;  %v314_v54 = vld [vmem:[%s2619_s26 + $0x6c0] sm:$0xff]  ;;  %v316_v55 = vld [vmem:[%s2619_s26 + $0x6c8] sm:$0xff] }
  0x44   : > { %v318_v56 = vld [vmem:[%s2619_s26 + $0x700] sm:$0xff]  ;;  %315 = vst [vmem:[%s2624_s30 + $0x1b0] sm:$0xff] %v314_v54  ;;  %317 = vst [vmem:[%s2624_s30 + $0x1b8] sm:$0xff] %v316_v55  ;;  %v320_v57 = vld [vmem:[%s2619_s26 + $0x708] sm:$0xff] }
  0x45   : > { %319 = vst [vmem:[%s2624_s30 + $0x1c0] sm:$0xff] %v318_v56  ;;  %v322_v58 = vld [vmem:[%s2619_s26 + $0x740] sm:$0xff]  ;;  %v324_v59 = vld [vmem:[%s2619_s26 + $0x748] sm:$0xff]  ;;  %321 = vst [vmem:[%s2624_s30 + $0x1c8] sm:$0xff] %v320_v57 }
  0x46   : > { %323 = vst [vmem:[%s2624_s30 + $0x1d0] sm:$0xff] %v322_v58  ;;  %325 = vst [vmem:[%s2624_s30 + $0x1d8] sm:$0xff] %v324_v59  ;;  %v326_v60 = vld [vmem:[%s2619_s26 + $0x780] sm:$0xff]  ;;  %v328_v61 = vld [vmem:[%s2619_s26 + $0x788] sm:$0xff] }
  0x47   : > { %v330_v62 = vld [vmem:[%s2619_s26 + $0x7c0] sm:$0xff]  ;;  %327 = vst [vmem:[%s2624_s30 + $0x1e0] sm:$0xff] %v326_v60  ;;  %329 = vst [vmem:[%s2624_s30 + $0x1e8] sm:$0xff] %v328_v61  ;;  %v332_v63 = vld [vmem:[%s2619_s26 + $0x7c8] sm:$0xff] }
  0x48   : > { %331 = vst [vmem:[%s2624_s30 + $0x1f0] sm:$0xff] %v330_v62  ;;  %333 = vst [vmem:[%s2624_s30 + $0x1f8] sm:$0xff] %v332_v63 }
  0x49 PF: > { %339 = sbr.rel (!%p2584_p3) target bundleno = 115 (0x73), region = 47  ;;  %s341_s6 = sand.u32 (%p2584_p3), 1, %s2470_s19  }
  0x4a   : > { %s1933_s8 = sshll.u32 (%p2584_p3), %s2482_s22, 4  ;;  %s1879_s12 = sshll.u32 (%p2584_p3), %s341_s6, 9 }
  0x4b   : > { %s3469_s2 = sld [smem:[#allocation11_spill]] (%p2584_p3)  ;;  %s2763_s5 = scalar_lea.vmem (%p2584_p3), [#allocation4], %s1879_s12 }
  0x51   : > { %s2758_s25 = scalar_lea.vmem %s3469_s2, %s1933_s8 }
  0x52   : > { %v359_v0 = vld [vmem:[%s2758_s25] sm:$0xff]  ;;  %v361_v1 = vld [vmem:[%s2758_s25 + $0x8] sm:$0xff] }
  0x53   : > { %v363_v2 = vld [vmem:[%s2758_s25 + $0x40] sm:$0xff]  ;;  %360 = vst [vmem:[%s2763_s5] sm:$0xff] %v359_v0  ;;  %362 = vst [vmem:[%s2763_s5 + $0x8] sm:$0xff] %v361_v1  ;;  %v365_v3 = vld [vmem:[%s2758_s25 + $0x48] sm:$0xff] }
  0x54   : > { %364 = vst [vmem:[%s2763_s5 + $0x10] sm:$0xff] %v363_v2  ;;  %v367_v4 = vld [vmem:[%s2758_s25 + $0x80] sm:$0xff]  ;;  %v369_v5 = vld [vmem:[%s2758_s25 + $0x88] sm:$0xff]  ;;  %366 = vst [vmem:[%s2763_s5 + $0x18] sm:$0xff] %v365_v3 }
  0x55   : > { %368 = vst [vmem:[%s2763_s5 + $0x20] sm:$0xff] %v367_v4  ;;  %370 = vst [vmem:[%s2763_s5 + $0x28] sm:$0xff] %v369_v5  ;;  %v371_v6 = vld [vmem:[%s2758_s25 + $0xc0] sm:$0xff]  ;;  %v373_v7 = vld [vmem:[%s2758_s25 + $0xc8] sm:$0xff] }
  0x56   : > { %v375_v8 = vld [vmem:[%s2758_s25 + $0x100] sm:$0xff]  ;;  %372 = vst [vmem:[%s2763_s5 + $0x30] sm:$0xff] %v371_v6  ;;  %374 = vst [vmem:[%s2763_s5 + $0x38] sm:$0xff] %v373_v7  ;;  %v377_v9 = vld [vmem:[%s2758_s25 + $0x108] sm:$0xff] }
  0x57   : > { %376 = vst [vmem:[%s2763_s5 + $0x40] sm:$0xff] %v375_v8  ;;  %v379_v10 = vld [vmem:[%s2758_s25 + $0x140] sm:$0xff]  ;;  %v381_v11 = vld [vmem:[%s2758_s25 + $0x148] sm:$0xff]  ;;  %378 = vst [vmem:[%s2763_s5 + $0x48] sm:$0xff] %v377_v9 }
  0x58   : > { %380 = vst [vmem:[%s2763_s5 + $0x50] sm:$0xff] %v379_v10  ;;  %382 = vst [vmem:[%s2763_s5 + $0x58] sm:$0xff] %v381_v11  ;;  %v383_v12 = vld [vmem:[%s2758_s25 + $0x180] sm:$0xff]  ;;  %v385_v13 = vld [vmem:[%s2758_s25 + $0x188] sm:$0xff] }
  0x59   : > { %v387_v14 = vld [vmem:[%s2758_s25 + $0x1c0] sm:$0xff]  ;;  %384 = vst [vmem:[%s2763_s5 + $0x60] sm:$0xff] %v383_v12  ;;  %386 = vst [vmem:[%s2763_s5 + $0x68] sm:$0xff] %v385_v13  ;;  %v389_v15 = vld [vmem:[%s2758_s25 + $0x1c8] sm:$0xff] }
  0x5a   : > { %388 = vst [vmem:[%s2763_s5 + $0x70] sm:$0xff] %v387_v14  ;;  %v391_v16 = vld [vmem:[%s2758_s25 + $0x200] sm:$0xff]  ;;  %v393_v17 = vld [vmem:[%s2758_s25 + $0x208] sm:$0xff]  ;;  %390 = vst [vmem:[%s2763_s5 + $0x78] sm:$0xff] %v389_v15 }
  0x5b   : > { %392 = vst [vmem:[%s2763_s5 + $0x80] sm:$0xff] %v391_v16  ;;  %394 = vst [vmem:[%s2763_s5 + $0x88] sm:$0xff] %v393_v17  ;;  %v395_v18 = vld [vmem:[%s2758_s25 + $0x240] sm:$0xff]  ;;  %v397_v19 = vld [vmem:[%s2758_s25 + $0x248] sm:$0xff] }
  0x5c   : > { %v399_v20 = vld [vmem:[%s2758_s25 + $0x280] sm:$0xff]  ;;  %396 = vst [vmem:[%s2763_s5 + $0x90] sm:$0xff] %v395_v18  ;;  %398 = vst [vmem:[%s2763_s5 + $0x98] sm:$0xff] %v397_v19  ;;  %v401_v21 = vld [vmem:[%s2758_s25 + $0x288] sm:$0xff] }
  0x5d   : > { %400 = vst [vmem:[%s2763_s5 + $0xa0] sm:$0xff] %v399_v20  ;;  %v403_v22 = vld [vmem:[%s2758_s25 + $0x2c0] sm:$0xff]  ;;  %v405_v23 = vld [vmem:[%s2758_s25 + $0x2c8] sm:$0xff]  ;;  %402 = vst [vmem:[%s2763_s5 + $0xa8] sm:$0xff] %v401_v21 }
  0x5e   : > { %404 = vst [vmem:[%s2763_s5 + $0xb0] sm:$0xff] %v403_v22  ;;  %406 = vst [vmem:[%s2763_s5 + $0xb8] sm:$0xff] %v405_v23  ;;  %v407_v24 = vld [vmem:[%s2758_s25 + $0x300] sm:$0xff]  ;;  %v409_v25 = vld [vmem:[%s2758_s25 + $0x308] sm:$0xff] }
  0x5f   : > { %v411_v26 = vld [vmem:[%s2758_s25 + $0x340] sm:$0xff]  ;;  %408 = vst [vmem:[%s2763_s5 + $0xc0] sm:$0xff] %v407_v24  ;;  %410 = vst [vmem:[%s2763_s5 + $0xc8] sm:$0xff] %v409_v25  ;;  %v413_v27 = vld [vmem:[%s2758_s25 + $0x348] sm:$0xff] }
  0x60   : > { %412 = vst [vmem:[%s2763_s5 + $0xd0] sm:$0xff] %v411_v26  ;;  %v415_v28 = vld [vmem:[%s2758_s25 + $0x380] sm:$0xff]  ;;  %v417_v29 = vld [vmem:[%s2758_s25 + $0x388] sm:$0xff]  ;;  %414 = vst [vmem:[%s2763_s5 + $0xd8] sm:$0xff] %v413_v27 }
  0x61   : > { %416 = vst [vmem:[%s2763_s5 + $0xe0] sm:$0xff] %v415_v28  ;;  %418 = vst [vmem:[%s2763_s5 + $0xe8] sm:$0xff] %v417_v29  ;;  %v419_v30 = vld [vmem:[%s2758_s25 + $0x3c0] sm:$0xff]  ;;  %v421_v31 = vld [vmem:[%s2758_s25 + $0x3c8] sm:$0xff] }
  0x62   : > { %v423_v32 = vld [vmem:[%s2758_s25 + $0x400] sm:$0xff]  ;;  %420 = vst [vmem:[%s2763_s5 + $0xf0] sm:$0xff] %v419_v30  ;;  %422 = vst [vmem:[%s2763_s5 + $0xf8] sm:$0xff] %v421_v31  ;;  %v425_v33 = vld [vmem:[%s2758_s25 + $0x408] sm:$0xff] }
  0x63   : > { %424 = vst [vmem:[%s2763_s5 + $0x100] sm:$0xff] %v423_v32  ;;  %v427_v34 = vld [vmem:[%s2758_s25 + $0x440] sm:$0xff]  ;;  %v429_v35 = vld [vmem:[%s2758_s25 + $0x448] sm:$0xff]  ;;  %426 = vst [vmem:[%s2763_s5 + $0x108] sm:$0xff] %v425_v33 }
  0x64   : > { %428 = vst [vmem:[%s2763_s5 + $0x110] sm:$0xff] %v427_v34  ;;  %430 = vst [vmem:[%s2763_s5 + $0x118] sm:$0xff] %v429_v35  ;;  %v431_v36 = vld [vmem:[%s2758_s25 + $0x480] sm:$0xff]  ;;  %v433_v37 = vld [vmem:[%s2758_s25 + $0x488] sm:$0xff] }
  0x65   : > { %v435_v38 = vld [vmem:[%s2758_s25 + $0x4c0] sm:$0xff]  ;;  %432 = vst [vmem:[%s2763_s5 + $0x120] sm:$0xff] %v431_v36  ;;  %434 = vst [vmem:[%s2763_s5 + $0x128] sm:$0xff] %v433_v37  ;;  %v437_v39 = vld [vmem:[%s2758_s25 + $0x4c8] sm:$0xff] }
  0x66   : > { %436 = vst [vmem:[%s2763_s5 + $0x130] sm:$0xff] %v435_v38  ;;  %v439_v40 = vld [vmem:[%s2758_s25 + $0x500] sm:$0xff]  ;;  %v441_v41 = vld [vmem:[%s2758_s25 + $0x508] sm:$0xff]  ;;  %438 = vst [vmem:[%s2763_s5 + $0x138] sm:$0xff] %v437_v39 }
  0x67   : > { %440 = vst [vmem:[%s2763_s5 + $0x140] sm:$0xff] %v439_v40  ;;  %442 = vst [vmem:[%s2763_s5 + $0x148] sm:$0xff] %v441_v41  ;;  %v443_v42 = vld [vmem:[%s2758_s25 + $0x540] sm:$0xff]  ;;  %v445_v43 = vld [vmem:[%s2758_s25 + $0x548] sm:$0xff] }
  0x68   : > { %v447_v44 = vld [vmem:[%s2758_s25 + $0x580] sm:$0xff]  ;;  %444 = vst [vmem:[%s2763_s5 + $0x150] sm:$0xff] %v443_v42  ;;  %446 = vst [vmem:[%s2763_s5 + $0x158] sm:$0xff] %v445_v43  ;;  %v449_v45 = vld [vmem:[%s2758_s25 + $0x588] sm:$0xff] }
  0x69   : > { %448 = vst [vmem:[%s2763_s5 + $0x160] sm:$0xff] %v447_v44  ;;  %v451_v46 = vld [vmem:[%s2758_s25 + $0x5c0] sm:$0xff]  ;;  %v453_v47 = vld [vmem:[%s2758_s25 + $0x5c8] sm:$0xff]  ;;  %450 = vst [vmem:[%s2763_s5 + $0x168] sm:$0xff] %v449_v45 }
  0x6a   : > { %452 = vst [vmem:[%s2763_s5 + $0x170] sm:$0xff] %v451_v46  ;;  %454 = vst [vmem:[%s2763_s5 + $0x178] sm:$0xff] %v453_v47  ;;  %v455_v48 = vld [vmem:[%s2758_s25 + $0x600] sm:$0xff]  ;;  %v457_v49 = vld [vmem:[%s2758_s25 + $0x608] sm:$0xff] }
  0x6b   : > { %v459_v50 = vld [vmem:[%s2758_s25 + $0x640] sm:$0xff]  ;;  %456 = vst [vmem:[%s2763_s5 + $0x180] sm:$0xff] %v455_v48  ;;  %458 = vst [vmem:[%s2763_s5 + $0x188] sm:$0xff] %v457_v49  ;;  %v461_v51 = vld [vmem:[%s2758_s25 + $0x648] sm:$0xff] }
  0x6c   : > { %460 = vst [vmem:[%s2763_s5 + $0x190] sm:$0xff] %v459_v50  ;;  %v463_v52 = vld [vmem:[%s2758_s25 + $0x680] sm:$0xff]  ;;  %v465_v53 = vld [vmem:[%s2758_s25 + $0x688] sm:$0xff]  ;;  %462 = vst [vmem:[%s2763_s5 + $0x198] sm:$0xff] %v461_v51 }
  0x6d   : > { %464 = vst [vmem:[%s2763_s5 + $0x1a0] sm:$0xff] %v463_v52  ;;  %466 = vst [vmem:[%s2763_s5 + $0x1a8] sm:$0xff] %v465_v53  ;;  %v467_v54 = vld [vmem:[%s2758_s25 + $0x6c0] sm:$0xff]  ;;  %v469_v55 = vld [vmem:[%s2758_s25 + $0x6c8] sm:$0xff] }
  0x6e   : > { %v471_v56 = vld [vmem:[%s2758_s25 + $0x700] sm:$0xff]  ;;  %468 = vst [vmem:[%s2763_s5 + $0x1b0] sm:$0xff] %v467_v54  ;;  %470 = vst [vmem:[%s2763_s5 + $0x1b8] sm:$0xff] %v469_v55  ;;  %v473_v57 = vld [vmem:[%s2758_s25 + $0x708] sm:$0xff] }
  0x6f   : > { %472 = vst [vmem:[%s2763_s5 + $0x1c0] sm:$0xff] %v471_v56  ;;  %v475_v58 = vld [vmem:[%s2758_s25 + $0x740] sm:$0xff]  ;;  %v477_v59 = vld [vmem:[%s2758_s25 + $0x748] sm:$0xff]  ;;  %474 = vst [vmem:[%s2763_s5 + $0x1c8] sm:$0xff] %v473_v57 }
  0x70   : > { %476 = vst [vmem:[%s2763_s5 + $0x1d0] sm:$0xff] %v475_v58  ;;  %478 = vst [vmem:[%s2763_s5 + $0x1d8] sm:$0xff] %v477_v59  ;;  %v479_v60 = vld [vmem:[%s2758_s25 + $0x780] sm:$0xff]  ;;  %v481_v61 = vld [vmem:[%s2758_s25 + $0x788] sm:$0xff] }
  0x71   : > { %v483_v62 = vld [vmem:[%s2758_s25 + $0x7c0] sm:$0xff]  ;;  %480 = vst [vmem:[%s2763_s5 + $0x1e0] sm:$0xff] %v479_v60  ;;  %482 = vst [vmem:[%s2763_s5 + $0x1e8] sm:$0xff] %v481_v61  ;;  %v485_v63 = vld [vmem:[%s2758_s25 + $0x7c8] sm:$0xff] }
  0x72   : > { %484 = vst [vmem:[%s2763_s5 + $0x1f0] sm:$0xff] %v483_v62  ;;  %486 = vst [vmem:[%s2763_s5 + $0x1f8] sm:$0xff] %v485_v63 }
  0x73 PF: > { %p1882_p0 = scmp.ge.s32.totalorder %s2490_s24, 1  ;;  %p501_p1 = scmp.lt.s32.totalorder %s2490_s24, 9 }
  0x75   : > { %p502_p2 = pnand %p1882_p0, %p501_p1 }
  0x76   : > { %s508_s29 = sand.u32 (!%p502_p2), 1, %s2466_s18   ;;  %s3459_s26 = sand.u32 (!%p502_p2), 1, %s2458_s16  }
  0x77   : > { %505 = sbr.rel (%p502_p2) target bundleno = 768 (0x300), region = 74  ;;  %s1883_s30 = sshll.u32 (!%p502_p2), %s508_s29, 9 }
  0x78   : > { %s1885_s6 = sshll.u32 (!%p502_p2), %s3459_s26, 8  ;;  %s1886_s8 = sshll.u32 (!%p502_p2), %s2478_s21, 4 }
  0x79   : > { %p557_p3 = scmp.lt.s32.totalorder (!%p502_p2), %s1886_s8, 31  ;;  %s1889_s12 = sshll.u32 (!%p502_p2), %s2474_s20, 5 }
  0x7a   : > { %p566_p4 = scmp.lt.s32.totalorder (!%p502_p2), %s1889_s12, 127  ;;  %s2908_s29 = scalar_lea.vmem (!%p502_p2), [#allocation3], %s1883_s30 }
  0x7b   : > { %s2910_s26 = scalar_lea.vmem (!%p502_p2), [#allocation4], %s1883_s30  ;;  %s2912_s27 = scalar_lea.vmem (!%p502_p2), [#allocation5], %s1885_s6 }
  0x7c   : > { %p1892_p5 = scmp.ne.s32.totalorder (!%p502_p2), %s2474_s20, 0 }
  0x7e   : > { %s3489_s8 = smov (!%p557_p3, %s1886_s8), 31  ;;  %s3491_s12 = smov (!%p566_p4, %s1889_s12), 127 }
  0x7f   : > { %s1934_s13 = sshll.u32 %s3489_s8, 4  ;;  %s1935_s1 = sshll.u32 %s3491_s12, 4  ;;  %v2492_v0 = vmov (!%p1892_p5), 0.0  }
  0x80   : > { %s2901_s5 = scalar_lea.vmem %s3453_s0, %s1934_s13  ;;  %s2906_s18 = scalar_lea.vmem %s3456_s3, %s1935_s1  ;;  %577 = vst [vmem:[#allocation2] sm:$0xff] (!%p1892_p5), %v2492_v0  ;;  %578 = vst [vmem:[#allocation2 + $0x8] sm:$0xff] (!%p1892_p5), %v2492_v0 }
  0x81   : > { %576 = sbr.rel (%p1892_p5) target bundleno = 144 (0x90), region = 86  ;;  %579 = vst [vmem:[#allocation2 + $0x10] sm:$0xff] (!%p1892_p5), %v2492_v0  ;;  %580 = vst [vmem:[#allocation2 + $0x18] sm:$0xff] (!%p1892_p5), %v2492_v0 }
  0x82   : > { %581 = vst [vmem:[#allocation2 + $0x20] sm:$0xff] (!%p1892_p5), %v2492_v0  ;;  %582 = vst [vmem:[#allocation2 + $0x28] sm:$0xff] (!%p1892_p5), %v2492_v0 }
  0x83   : > { %583 = vst [vmem:[#allocation2 + $0x30] sm:$0xff] (!%p1892_p5), %v2492_v0  ;;  %584 = vst [vmem:[#allocation2 + $0x38] sm:$0xff] (!%p1892_p5), %v2492_v0 }
  0x84   : > { %585 = vst [vmem:[#allocation2 + $0x40] sm:$0xff] (!%p1892_p5), %v2492_v0  ;;  %586 = vst [vmem:[#allocation2 + $0x48] sm:$0xff] (!%p1892_p5), %v2492_v0 }
  0x85   : > { %587 = vst [vmem:[#allocation2 + $0x50] sm:$0xff] (!%p1892_p5), %v2492_v0  ;;  %588 = vst [vmem:[#allocation2 + $0x58] sm:$0xff] (!%p1892_p5), %v2492_v0 }
  0x86   : > { %589 = vst [vmem:[#allocation2 + $0x60] sm:$0xff] (!%p1892_p5), %v2492_v0  ;;  %590 = vst [vmem:[#allocation2 + $0x68] sm:$0xff] (!%p1892_p5), %v2492_v0 }
  0x87   : > { %591 = vst [vmem:[#allocation2 + $0x70] sm:$0xff] (!%p1892_p5), %v2492_v0  ;;  %592 = vst [vmem:[#allocation2 + $0x78] sm:$0xff] (!%p1892_p5), %v2492_v0 }
  0x88   : > { %593 = vst [vmem:[#allocation2 + $0x80] sm:$0xff] %v2492_v0  ;;  %594 = vst [vmem:[#allocation2 + $0x88] sm:$0xff] %v2492_v0 }
  0x89   : > { %595 = vst [vmem:[#allocation2 + $0x90] sm:$0xff] %v2492_v0  ;;  %596 = vst [vmem:[#allocation2 + $0x98] sm:$0xff] %v2492_v0 }
  0x8a   : > { %597 = vst [vmem:[#allocation2 + $0xa0] sm:$0xff] %v2492_v0  ;;  %598 = vst [vmem:[#allocation2 + $0xa8] sm:$0xff] %v2492_v0 }
  0x8b   : > { %599 = vst [vmem:[#allocation2 + $0xb0] sm:$0xff] %v2492_v0  ;;  %600 = vst [vmem:[#allocation2 + $0xb8] sm:$0xff] %v2492_v0 }
  0x8c   : > { %601 = vst [vmem:[#allocation2 + $0xc0] sm:$0xff] %v2492_v0  ;;  %602 = vst [vmem:[#allocation2 + $0xc8] sm:$0xff] %v2492_v0 }
  0x8d   : > { %603 = vst [vmem:[#allocation2 + $0xd0] sm:$0xff] %v2492_v0  ;;  %604 = vst [vmem:[#allocation2 + $0xd8] sm:$0xff] %v2492_v0 }
  0x8e   : > { %605 = vst [vmem:[#allocation2 + $0xe0] sm:$0xff] %v2492_v0  ;;  %606 = vst [vmem:[#allocation2 + $0xe8] sm:$0xff] %v2492_v0 }
  0x8f   : > { %607 = vst [vmem:[#allocation2 + $0xf0] sm:$0xff] %v2492_v0  ;;  %608 = vst [vmem:[#allocation2 + $0xf8] sm:$0xff] %v2492_v0 }
  0x90 PF: > { %v642_v1 = vld [vmem:[%s2908_s29 + $0x8] sm:$0xff]  ;;  %v644_v2 = vld [vmem:[%s2908_s29 + $0x18] sm:$0xff]  ;;  %v641_v3 = vld [vmem:[%s2908_s29] sm:$0xff]  ;;  %p1925_p6 = scmp.ne.s32.totalorder %s2474_s20, 3 }
  0x91   : > { %v1938_v4 = vpack.c.bf16 %v644_v2, %v642_v1  ;;  %v643_v5 = vld [vmem:[%s2908_s29 + $0x10] sm:$0xff]  ;;  %v646_v6 = vld [vmem:[%s2908_s29 + $0x28] sm:$0xff]  ;;  %v648_v7 = vld [vmem:[%s2908_s29 + $0x38] sm:$0xff] }
  0x92   : > { %v1940_v8 = vpack.c.bf16 %v643_v5, %v641_v3  ;;  %v1942_v9 = vpack.c.bf16 %v648_v7, %v646_v6  ;;  %v645_v10 = vld [vmem:[%s2908_s29 + $0x20] sm:$0xff]  ;;  %v647_v11 = vld [vmem:[%s2908_s29 + $0x30] sm:$0xff]  ;;  %v650_v12 = vld [vmem:[%s2908_s29 + $0x48] sm:$0xff] }
  0x93   : > { %1939 = vmatprep.subr.bf16.mxu0 %v1938_v4  ;;  %v652_v13 = vld [vmem:[%s2908_s29 + $0x58] sm:$0xff]  ;;  %v1944_v14 = vpack.c.bf16 %v647_v11, %v645_v10  ;;  %v649_v16 = vld [vmem:[%s2908_s29 + $0x40] sm:$0xff]  ;;  %v651_v17 = vld [vmem:[%s2908_s29 + $0x50] sm:$0xff] }
  0x94   : > { %1941 = vmatpush1.bf16.msra.mxu0 %v1940_v8  ;;  %v1946_v15 = vpack.c.bf16 %v652_v13, %v650_v12  ;;  %v654_v18 = vld [vmem:[%s2908_s29 + $0x68] sm:$0xff]  ;;  %v656_v19 = vld [vmem:[%s2908_s29 + $0x78] sm:$0xff]  ;;  %v1948_v20 = vpack.c.bf16 %v651_v17, %v649_v16  ;;  %v653_v21 = vld [vmem:[%s2908_s29 + $0x60] sm:$0xff] }
  0x95   : > { %1943 = vmatprep.subr.bf16.mxu0 %v1942_v9  ;;  %v1950_v22 = vpack.c.bf16 %v656_v19, %v654_v18  ;;  %v655_v23 = vld [vmem:[%s2908_s29 + $0x70] sm:$0xff]  ;;  %v867_v24 = vld [vmem:[%s2910_s26 + $0x8] sm:$0xff]  ;;  %v869_v25 = vld [vmem:[%s2910_s26 + $0x18] sm:$0xff] }
  0x96   : > { %v658_v26 = vld [vmem:[%s2908_s29 + $0x88] sm:$0xff]  ;;  %v660_v27 = vld [vmem:[%s2908_s29 + $0x98] sm:$0xff]  ;;  %v2002_v28 = vpack.c.bf16 %v869_v25, %v867_v24  ;;  %v866_v29 = vld [vmem:[%s2910_s26] sm:$0xff]  ;;  %v1952_v31 = vpack.c.bf16 %v655_v23, %v653_v21 }
  0x97   : > { %v868_v30 = vld [vmem:[%s2910_s26 + $0x10] sm:$0xff]  ;;  %v657_v32 = vld [vmem:[%s2908_s29 + $0x80] sm:$0xff]  ;;  %v871_v34 = vld [vmem:[%s2910_s26 + $0x28] sm:$0xff]  ;;  %v1954_v36 = vpack.c.bf16 %v660_v27, %v658_v26 }
  0x98   : > { %1945 = vmatpush1.bf16.msra.mxu0 %v1944_v14  ;;  %2003 = vmatprep.subr.bf16.mxu1 %v2002_v28  ;;  %v2004_v33 = vpack.c.bf16 %v868_v30, %v866_v29  ;;  %v873_v35 = vld [vmem:[%s2910_s26 + $0x38] sm:$0xff]  ;;  %v659_v37 = vld [vmem:[%s2908_s29 + $0x90] sm:$0xff]  ;;  %v870_v39 = vld [vmem:[%s2910_s26 + $0x20] sm:$0xff] }
  0x99   : > { %1947 = vmatprep.subr.bf16.mxu0 %v1946_v15  ;;  %v2006_v38 = vpack.c.bf16 %v873_v35, %v871_v34  ;;  %v872_v40 = vld [vmem:[%s2910_s26 + $0x30] sm:$0xff]  ;;  %v662_v41 = vld [vmem:[%s2908_s29 + $0xa8] sm:$0xff]  ;;  %v664_v42 = vld [vmem:[%s2908_s29 + $0xb8] sm:$0xff]  ;;  %v1956_v46 = vpack.c.bf16 %v659_v37, %v657_v32 }
  0x9a   : > { %2005 = vmatpush1.bf16.msra.mxu1 %v2004_v33  ;;  %v2008_v43 = vpack.c.bf16 %v872_v40, %v870_v39  ;;  %v875_v44 = vld [vmem:[%s2910_s26 + $0x48] sm:$0xff]  ;;  %v877_v45 = vld [vmem:[%s2910_s26 + $0x58] sm:$0xff]  ;;  %v661_v47 = vld [vmem:[%s2908_s29 + $0xa0] sm:$0xff]  ;;  %v1958_v51 = vpack.c.bf16 %v664_v42, %v662_v41 }
  0x9b   : > { %2007 = vmatprep.subr.bf16.mxu1 %v2006_v38  ;;  %v2010_v48 = vpack.c.bf16 %v877_v45, %v875_v44  ;;  %v874_v49 = vld [vmem:[%s2910_s26 + $0x40] sm:$0xff]  ;;  %v876_v50 = vld [vmem:[%s2910_s26 + $0x50] sm:$0xff]  ;;  %v879_v53 = vld [vmem:[%s2910_s26 + $0x68] sm:$0xff] }
  0x9c   : > { %1949 = vmatpush1.bf16.msra.mxu0 %v1948_v20  ;;  %v663_v52 = vld [vmem:[%s2908_s29 + $0xb0] sm:$0xff]  ;;  %v881_v54 = vld [vmem:[%s2910_s26 + $0x78] sm:$0xff]  ;;  %v666_v55 = vld [vmem:[%s2908_s29 + $0xc8] sm:$0xff]  ;;  %v2012_v57 = vpack.c.bf16 %v876_v50, %v874_v49 }
  0x9d   : > { %1951 = vmatprep.subr.bf16.mxu0 %v1950_v22  ;;  %v668_v56 = vld [vmem:[%s2908_s29 + $0xd8] sm:$0xff]  ;;  %v2014_v58 = vpack.c.bf16 %v881_v54, %v879_v53  ;;  %v878_v59 = vld [vmem:[%s2910_s26 + $0x60] sm:$0xff]  ;;  %v880_v60 = vld [vmem:[%s2910_s26 + $0x70] sm:$0xff]  ;;  %v1960_v61 = vpack.c.bf16 %v663_v52, %v661_v47 }
  0x9e   : > { %2009 = vmatpush1.bf16.msra.mxu1 %v2008_v43  ;;  %v883_v62 = vld [vmem:[%s2910_s26 + $0x88] sm:$0xff]  ;;  %v885_v63 = vld [vmem:[%s2910_s26 + $0x98] sm:$0xff]  ;;  %v1962_v0 = vpack.c.bf16 %v668_v56, %v666_v55  ;;  %v665_v1 = vld [vmem:[%s2908_s29 + $0xc0] sm:$0xff]  ;;  %v2016_v5 = vpack.c.bf16 %v880_v60, %v878_v59 }
  0x9f   : > { %2011 = vmatprep.subr.bf16.mxu1 %v2010_v48  ;;  %v667_v2 = vld [vmem:[%s2908_s29 + $0xd0] sm:$0xff]  ;;  %v670_v3 = vld [vmem:[%s2908_s29 + $0xe8] sm:$0xff]  ;;  %v672_v4 = vld [vmem:[%s2908_s29 + $0xf8] sm:$0xff]  ;;  %v2018_v6 = vpack.c.bf16 %v885_v63, %v883_v62 }
  0xa0   : > { %1953 = vmatpush1.bf16.msra.mxu0 %v1952_v31  ;;  %v882_v7 = vld [vmem:[%s2910_s26 + $0x80] sm:$0xff]  ;;  %v884_v8 = vld [vmem:[%s2910_s26 + $0x90] sm:$0xff]  ;;  %v1964_v9 = vpack.c.bf16 %v667_v2, %v665_v1  ;;  %v887_v10 = vld [vmem:[%s2910_s26 + $0xa8] sm:$0xff]  ;;  %v1966_v12 = vpack.c.bf16 %v672_v4, %v670_v3 }
  0xa1   : > { %1955 = vmatprep.subr.bf16.mxu0 %v1954_v36  ;;  %v889_v11 = vld [vmem:[%s2910_s26 + $0xb8] sm:$0xff]  ;;  %v669_v13 = vld [vmem:[%s2908_s29 + $0xe0] sm:$0xff]  ;;  %v671_v14 = vld [vmem:[%s2908_s29 + $0xf0] sm:$0xff]  ;;  %v2020_v17 = vpack.c.bf16 %v884_v8, %v882_v7 }
  0xa2   : > { %2013 = vmatpush1.bf16.msra.mxu1 %v2012_v57  ;;  %v674_v15 = vld [vmem:[%s2908_s29 + $0x108] sm:$0xff]  ;;  %v676_v16 = vld [vmem:[%s2908_s29 + $0x118] sm:$0xff]  ;;  %v2022_v18 = vpack.c.bf16 %v889_v11, %v887_v10  ;;  %v886_v19 = vld [vmem:[%s2910_s26 + $0xa0] sm:$0xff]  ;;  %v1968_v21 = vpack.c.bf16 %v671_v14, %v669_v13 }
  0xa3   : > { %2015 = vmatprep.subr.bf16.mxu1 %v2014_v58  ;;  %v888_v20 = vld [vmem:[%s2910_s26 + $0xb0] sm:$0xff]  ;;  %v891_v22 = vld [vmem:[%s2910_s26 + $0xc8] sm:$0xff]  ;;  %v893_v23 = vld [vmem:[%s2910_s26 + $0xd8] sm:$0xff]  ;;  %v1970_v24 = vpack.c.bf16 %v676_v16, %v674_v15 }
  0xa4   : > { %1957 = vmatpush1.bf16.msra.mxu0 %v1956_v46  ;;  %v673_v25 = vld [vmem:[%s2908_s29 + $0x100] sm:$0xff]  ;;  %v675_v26 = vld [vmem:[%s2908_s29 + $0x110] sm:$0xff]  ;;  %v678_v27 = vld [vmem:[%s2908_s29 + $0x128] sm:$0xff]  ;;  %v2024_v29 = vpack.c.bf16 %v888_v20, %v886_v19  ;;  %v2026_v30 = vpack.c.bf16 %v893_v23, %v891_v22 }
  0xa5   : > { %1959 = vmatprep.subr.bf16.mxu0 %v1958_v51  ;;  %v680_v28 = vld [vmem:[%s2908_s29 + $0x138] sm:$0xff]  ;;  %v890_v31 = vld [vmem:[%s2910_s26 + $0xc0] sm:$0xff]  ;;  %v892_v32 = vld [vmem:[%s2910_s26 + $0xd0] sm:$0xff]  ;;  %v1972_v33 = vpack.c.bf16 %v675_v26, %v673_v25 }
  0xa6   : > { %2017 = vmatpush1.bf16.msra.mxu1 %v2016_v5  ;;  %v895_v34 = vld [vmem:[%s2910_s26 + $0xe8] sm:$0xff]  ;;  %v897_v35 = vld [vmem:[%s2910_s26 + $0xf8] sm:$0xff]  ;;  %v1974_v36 = vpack.c.bf16 %v680_v28, %v678_v27  ;;  %v677_v37 = vld [vmem:[%s2908_s29 + $0x120] sm:$0xff]  ;;  %v2028_v42 = vpack.c.bf16 %v892_v32, %v890_v31 }
  0xa7   : > { %2019 = vmatprep.subr.bf16.mxu1 %v2018_v6  ;;  %v679_v38 = vld [vmem:[%s2908_s29 + $0x130] sm:$0xff]  ;;  %v610_v39 = vld [vmem:[%s2901_s5 + $0x8] sm:$0xff]  ;;  %v684_v41 = vld [vmem:[%s2908_s29 + $0x158] sm:$0xff]  ;;  %v2030_v43 = vpack.c.bf16 %v897_v35, %v895_v34 }
  0xa8   : > { %1961 = vmatpush1.bf16.msra.mxu0 %v1960_v61  ;;  %v682_v40 = vld [vmem:[%s2908_s29 + $0x148] sm:$0xff]  ;;  %769 = vmatprep.mubr.f32.mxu0 %v610_v39  ;;  %v894_v44 = vld [vmem:[%s2910_s26 + $0xe0] sm:$0xff]  ;;  %v896_v45 = vld [vmem:[%s2910_s26 + $0xf0] sm:$0xff]  ;;  %v1976_v46 = vpack.c.bf16 %v679_v38, %v677_v37 }
  0xa9   : > { %1963 = vmatprep.subr.bf16.mxu0 %v1962_v0  ;;  %994 = vmatprep.mubr.f32.mxu1 %v610_v39  ;;  %v899_v47 = vld [vmem:[%s2910_s26 + $0x108] sm:$0xff]  ;;  %v901_v48 = vld [vmem:[%s2910_s26 + $0x118] sm:$0xff]  ;;  %v1978_v49 = vpack.c.bf16 %v684_v41, %v682_v40  ;;  %v681_v50 = vld [vmem:[%s2908_s29 + $0x140] sm:$0xff]  ;;  %v2032_v54 = vpack.c.bf16 %v896_v45, %v894_v44 }
  0xaa   : > { %2021 = vmatpush1.bf16.msra.mxu1 %v2020_v17  ;;  %v683_v51 = vld [vmem:[%s2908_s29 + $0x150] sm:$0xff]  ;;  %v686_v52 = vld [vmem:[%s2908_s29 + $0x168] sm:$0xff]  ;;  %v688_v53 = vld [vmem:[%s2908_s29 + $0x178] sm:$0xff]  ;;  %v2034_v55 = vpack.c.bf16 %v901_v48, %v899_v47 }
  0xab   : > { %2023 = vmatprep.subr.bf16.mxu1 %v2022_v18  ;;  %v898_v56 = vld [vmem:[%s2910_s26 + $0x100] sm:$0xff]  ;;  %v900_v57 = vld [vmem:[%s2910_s26 + $0x110] sm:$0xff]  ;;  %v1980_v58 = vpack.c.bf16 %v683_v51, %v681_v50  ;;  %v903_v59 = vld [vmem:[%s2910_s26 + $0x128] sm:$0xff]  ;;  %v1982_v61 = vpack.c.bf16 %v688_v53, %v686_v52 }
  0xac   : > { %1965 = vmatpush1.bf16.msra.mxu0 %v1964_v9  ;;  %v905_v60 = vld [vmem:[%s2910_s26 + $0x138] sm:$0xff]  ;;  %v685_v62 = vld [vmem:[%s2908_s29 + $0x160] sm:$0xff]  ;;  %v687_v63 = vld [vmem:[%s2908_s29 + $0x170] sm:$0xff]  ;;  %v2036_v2 = vpack.c.bf16 %v900_v57, %v898_v56 }
  0xad   : > { %1967 = vmatprep.subr.bf16.mxu0 %v1966_v12  ;;  %v690_v0 = vld [vmem:[%s2908_s29 + $0x188] sm:$0xff]  ;;  %v692_v1 = vld [vmem:[%s2908_s29 + $0x198] sm:$0xff]  ;;  %v2038_v3 = vpack.c.bf16 %v905_v60, %v903_v59  ;;  %v902_v4 = vld [vmem:[%s2910_s26 + $0x120] sm:$0xff]  ;;  %v1984_v6 = vpack.c.bf16 %v687_v63, %v685_v62 }
  0xae   : > { %2025 = vmatpush1.bf16.msra.mxu1 %v2024_v29  ;;  %v904_v5 = vld [vmem:[%s2910_s26 + $0x130] sm:$0xff]  ;;  %v907_v7 = vld [vmem:[%s2910_s26 + $0x148] sm:$0xff]  ;;  %v909_v8 = vld [vmem:[%s2910_s26 + $0x158] sm:$0xff]  ;;  %v1986_v9 = vpack.c.bf16 %v692_v1, %v690_v0 }
  0xaf   : > { %2027 = vmatprep.subr.bf16.mxu1 %v2026_v30  ;;  %v689_v10 = vld [vmem:[%s2908_s29 + $0x180] sm:$0xff]  ;;  %v691_v11 = vld [vmem:[%s2908_s29 + $0x190] sm:$0xff]  ;;  %v694_v12 = vld [vmem:[%s2908_s29 + $0x1a8] sm:$0xff]  ;;  %v2040_v14 = vpack.c.bf16 %v904_v5, %v902_v4  ;;  %v2042_v15 = vpack.c.bf16 %v909_v8, %v907_v7 }
  0xb0   : > { %1969 = vmatpush1.bf16.msra.mxu0 %v1968_v21  ;;  %v696_v13 = vld [vmem:[%s2908_s29 + $0x1b8] sm:$0xff]  ;;  %v906_v16 = vld [vmem:[%s2910_s26 + $0x140] sm:$0xff]  ;;  %v908_v17 = vld [vmem:[%s2910_s26 + $0x150] sm:$0xff]  ;;  %v1988_v18 = vpack.c.bf16 %v691_v11, %v689_v10 }
  0xb1   : > { %1971 = vmatprep.subr.bf16.mxu0 %v1970_v24  ;;  %v911_v19 = vld [vmem:[%s2910_s26 + $0x168] sm:$0xff]  ;;  %v913_v20 = vld [vmem:[%s2910_s26 + $0x178] sm:$0xff]  ;;  %v1990_v21 = vpack.c.bf16 %v696_v13, %v694_v12  ;;  %v693_v22 = vld [vmem:[%s2908_s29 + $0x1a0] sm:$0xff]  ;;  %v2044_v26 = vpack.c.bf16 %v908_v17, %v906_v16 }
  0xb2   : > { %2029 = vmatpush1.bf16.msra.mxu1 %v2028_v42  ;;  %v695_v23 = vld [vmem:[%s2908_s29 + $0x1b0] sm:$0xff]  ;;  %v698_v24 = vld [vmem:[%s2908_s29 + $0x1c8] sm:$0xff]  ;;  %v700_v25 = vld [vmem:[%s2908_s29 + $0x1d8] sm:$0xff]  ;;  %v2046_v27 = vpack.c.bf16 %v913_v20, %v911_v19 }
  0xb3   : > { %2031 = vmatprep.subr.bf16.mxu1 %v2030_v43  ;;  %v910_v28 = vld [vmem:[%s2910_s26 + $0x160] sm:$0xff]  ;;  %v912_v29 = vld [vmem:[%s2910_s26 + $0x170] sm:$0xff]  ;;  %v1992_v30 = vpack.c.bf16 %v695_v23, %v693_v22  ;;  %v915_v31 = vld [vmem:[%s2910_s26 + $0x188] sm:$0xff] }
  0xb4   : > { %1973 = vmatpush1.bf16.msra.mxu0 %v1972_v33  ;;  %v917_v32 = vld [vmem:[%s2910_s26 + $0x198] sm:$0xff]  ;;  %v1994_v33 = vpack.c.bf16 %v700_v25, %v698_v24  ;;  %v697_v34 = vld [vmem:[%s2908_s29 + $0x1c0] sm:$0xff]  ;;  %v699_v35 = vld [vmem:[%s2908_s29 + $0x1d0] sm:$0xff]  ;;  %v2048_v38 = vpack.c.bf16 %v912_v29, %v910_v28 }
  0xb5   : > { %1975 = vmatprep.subr.bf16.mxu0 %v1974_v36  ;;  %v702_v36 = vld [vmem:[%s2908_s29 + $0x1e8] sm:$0xff]  ;;  %v704_v37 = vld [vmem:[%s2908_s29 + $0x1f8] sm:$0xff]  ;;  %v2050_v39 = vpack.c.bf16 %v917_v32, %v915_v31  ;;  %v914_v40 = vld [vmem:[%s2910_s26 + $0x180] sm:$0xff]  ;;  %v1996_v42 = vpack.c.bf16 %v699_v35, %v697_v34 }
  0xb6   : > { %2033 = vmatpush1.bf16.msra.mxu1 %v2032_v54  ;;  %v916_v41 = vld [vmem:[%s2910_s26 + $0x190] sm:$0xff]  ;;  %v919_v43 = vld [vmem:[%s2910_s26 + $0x1a8] sm:$0xff]  ;;  %v921_v44 = vld [vmem:[%s2910_s26 + $0x1b8] sm:$0xff]  ;;  %v1998_v45 = vpack.c.bf16 %v704_v37, %v702_v36 }
  0xb7   : > { %2035 = vmatprep.subr.bf16.mxu1 %v2034_v55  ;;  %v703_v47 = vld [vmem:[%s2908_s29 + $0x1f0] sm:$0xff]  ;;  %v2052_v48 = vpack.c.bf16 %v916_v41, %v914_v40  ;;  %v1382_v50 = vld [vmem:[%s2906_s18 + $0x18] sm:$0xff]  ;;  %v2054_v51 = vpack.c.bf16 %v921_v44, %v919_v43  ;;  %v918_v52 = vld [vmem:[%s2910_s26 + $0x1a0] sm:$0xff] }
  0xb8   : > { %1977 = vmatpush1.bf16.msra.mxu0 %v1976_v46  ;;  %v701_v46 = vld [vmem:[%s2908_s29 + $0x1e0] sm:$0xff]  ;;  %v920_v53 = vld [vmem:[%s2910_s26 + $0x1b0] sm:$0xff]  ;;  %v923_v55 = vld [vmem:[%s2910_s26 + $0x1c8] sm:$0xff] }
  0xb9   : > { %1979 = vmatprep.subr.bf16.mxu0 %v1978_v49  ;;  %v1380_v49 = vld [vmem:[%s2906_s18 + $0x8] sm:$0xff]  ;;  %v2000_v54 = vpack.c.bf16 %v703_v47, %v701_v46  ;;  %v925_v56 = vld [vmem:[%s2910_s26 + $0x1d8] sm:$0xff]  ;;  %v1381_v59 = vld [vmem:[%s2906_s18 + $0x10] sm:$0xff]  ;;  %v2056_v60 = vpack.c.bf16 %v920_v53, %v918_v52 }
  0xba   : > { %2037 = vmatpush1.bf16.msra.mxu1 %v2036_v2  ;;  %v2066_v57 = vpack.c.bf16 %v1382_v50, %v1380_v49  ;;  %v1386_v62 = vld [vmem:[%s2906_s18 + $0x38] sm:$0xff]  ;;  %v2058_v63 = vpack.c.bf16 %v925_v56, %v923_v55  ;;  %v922_v0 = vld [vmem:[%s2910_s26 + $0x1c0] sm:$0xff]  ;;  %v924_v1 = vld [vmem:[%s2910_s26 + $0x1d0] sm:$0xff] }
  0xbb   : > { %2039 = vmatprep.subr.bf16.mxu1 %v2038_v3  ;;  %v609_v2 = vld [vmem:[%s2901_s5] sm:$0xff]  ;;  %v927_v3 = vld [vmem:[%s2910_s26 + $0x1e8] sm:$0xff]  ;;  %v929_v4 = vld [vmem:[%s2910_s26 + $0x1f8] sm:$0xff]  ;;  %v2060_v10 = vpack.c.bf16 %v924_v1, %v922_v0 }
  0xbc   : > { %1981 = vmatpush1.bf16.msra.mxu0 %v1980_v58  ;;  %v1379_v58 = vld [vmem:[%s2906_s18] sm:$0xff]  ;;  %v1388_v11 = vld [vmem:[%s2906_s18 + $0x48] sm:$0xff]  ;;  %v1390_v12 = vld [vmem:[%s2906_s18 + $0x58] sm:$0xff]  ;;  %v2062_v13 = vpack.c.bf16 %v929_v4, %v927_v3 }
  0xbd   : > { %1983 = vmatprep.subr.bf16.mxu0 %v1982_v61  ;;  %v1384_v61 = vld [vmem:[%s2906_s18 + $0x28] sm:$0xff]  ;;  %v2068_v5 = vpack.c.bf16 %v1381_v59, %v1379_v58  ;;  %v1383_v8 = vld [vmem:[%s2906_s18 + $0x20] sm:$0xff]  ;;  %v611_v16 = vld [vmem:[%s2901_s5 + $0x10] sm:$0xff]  ;;  %v2074_v19 = vpack.c.bf16 %v1390_v12, %v1388_v11 }
  0xbe   : > { %2041 = vmatpush1.bf16.msra.mxu1 %v2040_v14  ;;  %v2070_v7 = vpack.c.bf16 %v1386_v62, %v1384_v61  ;;  %v926_v14 = vld [vmem:[%s2910_s26 + $0x1e0] sm:$0xff]  ;;  %v1392_v23 = vld [vmem:[%s2906_s18 + $0x68] sm:$0xff]  ;;  %v1394_v24 = vld [vmem:[%s2906_s18 + $0x78] sm:$0xff] }
  0xbf   : > { %2043 = vmatprep.subr.bf16.mxu1 %v2042_v15  ;;  %v928_v15 = vld [vmem:[%s2910_s26 + $0x1f0] sm:$0xff]  ;;  %v1387_v20 = vld [vmem:[%s2906_s18 + $0x40] sm:$0xff]  ;;  %v2078_v28 = vpack.c.bf16 %v1394_v24, %v1392_v23  ;;  %v1396_v31 = vld [vmem:[%s2906_s18 + $0x88] sm:$0xff] }
  0xc0   : > { %1985 = vmatpush1.bf16.msra.mxu0 %v1984_v6  ;;  %v612_v6 = vld [vmem:[%s2901_s5 + $0x18] sm:$0xff]  ;;  %v2064_v22 = vpack.c.bf16 %v928_v15, %v926_v14  ;;  %v613_v25 = vld [vmem:[%s2901_s5 + $0x20] sm:$0xff]  ;;  %v618_v35 = vld [vmem:[%s2901_s5 + $0x48] sm:$0xff] }
  0xc1   : > { %1987 = vmatprep.subr.bf16.mxu0 %v1986_v9  ;;  %v1385_v9 = vld [vmem:[%s2906_s18 + $0x30] sm:$0xff]  ;;  %v1391_v29 = vld [vmem:[%s2906_s18 + $0x60] sm:$0xff]  ;;  %v1398_v32 = vld [vmem:[%s2906_s18 + $0x98] sm:$0xff] }
  0xc2   : > { %2045 = vmatpush1.bf16.msra.mxu1 %v2044_v26  ;;  %v2072_v17 = vpack.c.bf16 %v1385_v9, %v1383_v8  ;;  %v2082_v36 = vpack.c.bf16 %v1398_v32, %v1396_v31  ;;  %v1395_v37 = vld [vmem:[%s2906_s18 + $0x80] sm:$0xff]  ;;  %v1402_v40 = vld [vmem:[%s2906_s18 + $0xb8] sm:$0xff]  ;;  %v1401_v46 = vld [vmem:[%s2906_s18 + $0xb0] sm:$0xff] }
  0xc3   : > { %2047 = vmatprep.subr.bf16.mxu1 %v2046_v27  ;;  %v616_v27 = vld [vmem:[%s2901_s5 + $0x38] sm:$0xff]  ;;  %v617_v41 = vld [vmem:[%s2901_s5 + $0x40] sm:$0xff]  ;;  %v1404_v47 = vld [vmem:[%s2906_s18 + $0xc8] sm:$0xff] }
  0xc4   : > { %1989 = vmatpush1.bf16.msra.mxu0 %v1988_v18  ;;  %v614_v18 = vld [vmem:[%s2901_s5 + $0x28] sm:$0xff]  ;;  %v620_v43 = vld [vmem:[%s2901_s5 + $0x58] sm:$0xff]  ;;  %v619_v49 = vld [vmem:[%s2901_s5 + $0x50] sm:$0xff] }
  0xc5   : > { %1991 = vmatprep.subr.bf16.mxu0 %v1990_v21  ;;  %v1389_v21 = vld [vmem:[%s2906_s18 + $0x50] sm:$0xff]  ;;  %v1403_v53 = vld [vmem:[%s2906_s18 + $0xc0] sm:$0xff]  ;;  %v1408_v55 = vld [vmem:[%s2906_s18 + $0xe8] sm:$0xff] }
  0xc6   : > { %2049 = vmatpush1.bf16.msra.mxu1 %v2048_v38  ;;  %v2076_v26 = vpack.c.bf16 %v1389_v21, %v1387_v20  ;;  %v1397_v38 = vld [vmem:[%s2906_s18 + $0x90] sm:$0xff]  ;;  %v1410_v56 = vld [vmem:[%s2906_s18 + $0xf8] sm:$0xff]  ;;  %v1407_v61 = vld [vmem:[%s2906_s18 + $0xe0] sm:$0xff] }
  0xc7   : > { %2051 = vmatprep.subr.bf16.mxu1 %v2050_v39  ;;  %v1400_v39 = vld [vmem:[%s2906_s18 + $0xa8] sm:$0xff]  ;;  %v624_v59 = vld [vmem:[%s2901_s5 + $0x78] sm:$0xff]  ;;  %v1409_v62 = vld [vmem:[%s2906_s18 + $0xf0] sm:$0xff] }
  0xc8   : > { %1993 = vmatpush1.bf16.msra.mxu0 %v1992_v30  ;;  %v1393_v30 = vld [vmem:[%s2906_s18 + $0x70] sm:$0xff]  ;;  %v2086_v44 = vpack.c.bf16 %v1402_v40, %v1400_v39  ;;  %v2096_v0 = vpack.c.bf16 %v1409_v62, %v1407_v61  ;;  %v626_v1 = vld [vmem:[%s2901_s5 + $0x88] sm:$0xff]  ;;  %v628_v3 = vld [vmem:[%s2901_s5 + $0x98] sm:$0xff] }
  0xc9   : > { %1995 = vmatprep.subr.bf16.mxu0 %v1994_v33  ;;  %v615_v33 = vld [vmem:[%s2901_s5 + $0x30] sm:$0xff]  ;;  %v2080_v34 = vpack.c.bf16 %v1393_v30, %v1391_v29  ;;  %v634_v9 = vld [vmem:[%s2901_s5 + $0xc8] sm:$0xff]  ;;  %v636_v11 = vld [vmem:[%s2901_s5 + $0xd8] sm:$0xff] }
  0xca   : > { %2053 = vmatpush1.bf16.msra.mxu1 %v2052_v48  ;;  %v1406_v48 = vld [vmem:[%s2906_s18 + $0xd8] sm:$0xff]  ;;  %v627_v4 = vld [vmem:[%s2901_s5 + $0x90] sm:$0xff]  ;;  %v637_v14 = vld [vmem:[%s2901_s5 + $0xe0] sm:$0xff] }
  0xcb   : > { %2055 = vmatprep.subr.bf16.mxu1 %v2054_v51  ;;  %v622_v51 = vld [vmem:[%s2901_s5 + $0x68] sm:$0xff]  ;;  %v2090_v52 = vpack.c.bf16 %v1406_v48, %v1404_v47  ;;  %v631_v8 = vld [vmem:[%s2901_s5 + $0xb0] sm:$0xff]  ;;  %v640_v15 = vld [vmem:[%s2901_s5 + $0xf8] sm:$0xff] }
  0xcc   : > { %1997 = vmatpush1.bf16.msra.mxu0 %v1996_v42  ;;  %v2084_v42 = vpack.c.bf16 %v1397_v38, %v1395_v37  ;;  %v635_v12 = vld [vmem:[%s2901_s5 + $0xd0] sm:$0xff]  ;;  %v1411_v20 = vld [vmem:[%s2906_s18 + $0x100] sm:$0xff]  ;;  %v1416_v23 = vld [vmem:[%s2906_s18 + $0x128] sm:$0xff] }
  0xcd   : > { %1999 = vmatprep.subr.bf16.mxu0 %v1998_v45  ;;  %v1399_v45 = vld [vmem:[%s2906_s18 + $0xa0] sm:$0xff]  ;;  %v1413_v21 = vld [vmem:[%s2906_s18 + $0x110] sm:$0xff]  ;;  %v1418_v24 = vld [vmem:[%s2906_s18 + $0x138] sm:$0xff] }
  0xce   : > { %2057 = vmatpush1.bf16.msra.mxu1 %v2056_v60  ;;  %v2088_v50 = vpack.c.bf16 %v1401_v46, %v1399_v45  ;;  %v2094_v60 = vpack.c.bf16 %v1410_v56, %v1408_v55  ;;  %v1420_v29 = vld [vmem:[%s2906_s18 + $0x148] sm:$0xff]  ;;  %v1422_v30 = vld [vmem:[%s2906_s18 + $0x158] sm:$0xff]  ;;  %v1419_v32 = vld [vmem:[%s2906_s18 + $0x140] sm:$0xff] }
  0xcf   : > { %2059 = vmatprep.subr.bf16.mxu1 %v2058_v63  ;;  %v623_v63 = vld [vmem:[%s2901_s5 + $0x70] sm:$0xff]  ;;  %v2106_v31 = vpack.c.bf16 %v1422_v30, %v1420_v29  ;;  %v1423_v38 = vld [vmem:[%s2906_s18 + $0x160] sm:$0xff]  ;;  %v1432_v47 = vld [vmem:[%s2906_s18 + $0x1a8] sm:$0xff] }
  0xd0   : > { %2001 = vmatpush1.bf16.msra.mxu0 %v2000_v54  ;;  %v1405_v54 = vld [vmem:[%s2906_s18 + $0xd0] sm:$0xff]  ;;  %v1434_v48 = vld [vmem:[%s2906_s18 + $0x1b8] sm:$0xff]  ;;  %v1435_v56 = vld [vmem:[%s2906_s18 + $0x1c0] sm:$0xff] }
  0xd1   : > { %2067 = vmatprep.subr.bf16.mxu0 %v2066_v57  ;;  %v2092_v58 = vpack.c.bf16 %v1405_v54, %v1403_v53  ;;  %v1425_v39 = vld [vmem:[%s2906_s18 + $0x170] sm:$0xff]  ;;  %v1436_v53 = vld [vmem:[%s2906_s18 + $0x1c8] sm:$0xff]  ;;  %v1438_v54 = vld [vmem:[%s2906_s18 + $0x1d8] sm:$0xff] }
  0xd2   : > { %2061 = vmatpush1.bf16.msra.mxu1 %v2060_v10  ;;  %v633_v10 = vld [vmem:[%s2901_s5 + $0xc0] sm:$0xff]  ;;  %v2112_v40 = vpack.c.bf16 %v1425_v39, %v1423_v38  ;;  %v1429_v45 = vld [vmem:[%s2906_s18 + $0x190] sm:$0xff]  ;;  %v2122_v55 = vpack.c.bf16 %v1438_v54, %v1436_v53 }
  0xd3   : > { %770 = vmatmul.mubr.f32.vlgmr.msra.gmra.mrb[0].mxu0 %v609_v2  ;;  %2063 = vmatprep.subr.bf16.mxu1 %v2062_v13  ;;  %v638_v13 = vld [vmem:[%s2901_s5 + $0xe8] sm:$0xff]  ;;  %v1439_v62 = vld [vmem:[%s2906_s18 + $0x1e0] sm:$0xff] }
  0xd4   : > { %775 = vmatprep.mubr.f32.mxu0 %v612_v6  ;;  %2069 = vmatpush1.bf16.msra.mxu0 %v2068_v5 }
  0xd5   : > { %2071 = vmatprep.subr.bf16.mxu0 %v2070_v7 }
  0xd6   : > { %2065 = vmatpush1.bf16.msra.mxu1 %v2064_v22  ;;  %v2100_v22 = vpack.c.bf16 %v1413_v21, %v1411_v20 }
  0xd7   : > { %776 = vmatmul.mubr.f32.gmra.mrb[2].mxu0 %v611_v16  ;;  %2130 = vmatprep.subr.bf16.mxu1 %v2066_v57  ;;  %v621_v57 = vld [vmem:[%s2901_s5 + $0x60] sm:$0xff] }
  0xd8   : > { %781 = vmatprep.mubr.f32.mxu0 %v614_v18  ;;  %2073 = vmatpush1.bf16.msra.mxu0 %v2072_v17 }
  0xd9   : > { %2075 = vmatprep.subr.bf16.mxu0 %v2074_v19  ;;  %995 = vmatmul.mubr.f32.vlgmr.msra.gmra.mrb[0].mxu1 %v609_v2  ;;  %v625_v2 = vld [vmem:[%s2901_s5 + $0x80] sm:$0xff] }
  0xda   : > { %1000 = vmatprep.mubr.f32.mxu1 %v612_v6  ;;  %2146 = vmatpush1.bf16.msra.mxu1 %v2068_v5  ;;  %v630_v5 = vld [vmem:[%s2901_s5 + $0xa8] sm:$0xff]  ;;  %v629_v6 = vld [vmem:[%s2901_s5 + $0xa0] sm:$0xff] }
  0xdb   : > { %782 = vmatmul.mubr.f32.gmra.mrb[4].mxu0 %v613_v25  ;;  %2131 = vmatprep.subr.bf16.mxu1 %v2070_v7  ;;  %v632_v7 = vld [vmem:[%s2901_s5 + $0xb8] sm:$0xff] }
  0xdc   : > { %787 = vmatprep.mubr.f32.mxu0 %v616_v27  ;;  %2077 = vmatpush1.bf16.msra.mxu0 %v2076_v26 }
  0xdd   : > { %2079 = vmatprep.subr.bf16.mxu0 %v2078_v28  ;;  %1001 = vmatmul.mubr.f32.gmra.mrb[2].mxu1 %v611_v16  ;;  %v639_v16 = vld [vmem:[%s2901_s5 + $0xf0] sm:$0xff] }
  0xde   : > { %1006 = vmatprep.mubr.f32.mxu1 %v614_v18  ;;  %2147 = vmatpush1.bf16.msra.mxu1 %v2072_v17  ;;  %v1412_v17 = vld [vmem:[%s2906_s18 + $0x108] sm:$0xff]  ;;  %v1414_v18 = vld [vmem:[%s2906_s18 + $0x118] sm:$0xff] }
  0xdf   : > { %788 = vmatmul.mubr.f32.gmra.mrb[6].mxu0 %v615_v33  ;;  %2132 = vmatprep.subr.bf16.mxu1 %v2074_v19  ;;  %v2098_v19 = vpack.c.bf16 %v1414_v18, %v1412_v17 }
  0xe0   : > { %793 = vmatprep.mubr.f32.mxu0 %v618_v35  ;;  %2081 = vmatpush1.bf16.msra.mxu0 %v2080_v34 }
  0xe1   : > { %2083 = vmatprep.subr.bf16.mxu0 %v2082_v36  ;;  %1007 = vmatmul.mubr.f32.gmra.mrb[4].mxu1 %v613_v25  ;;  %v2102_v25 = vpack.c.bf16 %v1418_v24, %v1416_v23 }
  0xe2   : > { %1012 = vmatprep.mubr.f32.mxu1 %v616_v27  ;;  %2148 = vmatpush1.bf16.msra.mxu1 %v2076_v26  ;;  %v1415_v26 = vld [vmem:[%s2906_s18 + $0x120] sm:$0xff]  ;;  %v1417_v27 = vld [vmem:[%s2906_s18 + $0x130] sm:$0xff] }
  0xe3   : > { %794 = vmatmul.mubr.f32.gmra.mrb[8].mxu0 %v617_v41  ;;  %2133 = vmatprep.subr.bf16.mxu1 %v2078_v28  ;;  %v2104_v28 = vpack.c.bf16 %v1417_v27, %v1415_v26 }
  0xe4   : > { %799 = vmatprep.mubr.f32.mxu0 %v620_v43  ;;  %2085 = vmatpush1.bf16.msra.mxu0 %v2084_v42 }
  0xe5   : > { %2087 = vmatprep.subr.bf16.mxu0 %v2086_v44  ;;  %1013 = vmatmul.mubr.f32.gmra.mrb[6].mxu1 %v615_v33  ;;  %v1421_v33 = vld [vmem:[%s2906_s18 + $0x150] sm:$0xff] }
  0xe6   : > { %1018 = vmatprep.mubr.f32.mxu1 %v618_v35  ;;  %2149 = vmatpush1.bf16.msra.mxu1 %v2080_v34  ;;  %v2108_v34 = vpack.c.bf16 %v1421_v33, %v1419_v32  ;;  %v1424_v35 = vld [vmem:[%s2906_s18 + $0x168] sm:$0xff] }
  0xe7   : > { %800 = vmatmul.mubr.f32.gmra.mrb[10].mxu0 %v619_v49  ;;  %2134 = vmatprep.subr.bf16.mxu1 %v2082_v36  ;;  %v1426_v36 = vld [vmem:[%s2906_s18 + $0x178] sm:$0xff] }
  0xe8   : > { %805 = vmatprep.mubr.f32.mxu0 %v622_v51  ;;  %2089 = vmatpush1.bf16.msra.mxu0 %v2088_v50  ;;  %v2110_v37 = vpack.c.bf16 %v1426_v36, %v1424_v35 }
  0xe9   : > { %2091 = vmatprep.subr.bf16.mxu0 %v2090_v52  ;;  %1019 = vmatmul.mubr.f32.gmra.mrb[8].mxu1 %v617_v41  ;;  %v1428_v41 = vld [vmem:[%s2906_s18 + $0x188] sm:$0xff] }
  0xea   : > { %1024 = vmatprep.mubr.f32.mxu1 %v620_v43  ;;  %2150 = vmatpush1.bf16.msra.mxu1 %v2084_v42  ;;  %v1430_v42 = vld [vmem:[%s2906_s18 + $0x198] sm:$0xff] }
  0xeb   : > { %806 = vmatmul.mubr.f32.gmra.mrb[12].mxu0 %v621_v57  ;;  %2135 = vmatprep.subr.bf16.mxu1 %v2086_v44  ;;  %v2114_v43 = vpack.c.bf16 %v1430_v42, %v1428_v41  ;;  %v1427_v44 = vld [vmem:[%s2906_s18 + $0x180] sm:$0xff] }
  0xec   : > { %811 = vmatprep.mubr.f32.mxu0 %v624_v59  ;;  %2093 = vmatpush1.bf16.msra.mxu0 %v2092_v58  ;;  %v2116_v46 = vpack.c.bf16 %v1429_v45, %v1427_v44 }
  0xed   : > { %2095 = vmatprep.subr.bf16.mxu0 %v2094_v60  ;;  %1025 = vmatmul.mubr.f32.gmra.mrb[10].mxu1 %v619_v49  ;;  %v2118_v49 = vpack.c.bf16 %v1434_v48, %v1432_v47 }
  0xee   : > { %1030 = vmatprep.mubr.f32.mxu1 %v622_v51  ;;  %2151 = vmatpush1.bf16.msra.mxu1 %v2088_v50  ;;  %v1431_v50 = vld [vmem:[%s2906_s18 + $0x1a0] sm:$0xff]  ;;  %v1433_v51 = vld [vmem:[%s2906_s18 + $0x1b0] sm:$0xff] }
  0xef   : > { %812 = vmatmul.mubr.f32.gmra.mrb[14].mxu0 %v623_v63  ;;  %2136 = vmatprep.subr.bf16.mxu1 %v2090_v52  ;;  %v2120_v52 = vpack.c.bf16 %v1433_v51, %v1431_v50 }
  0xf0   : > { %817 = vmatprep.mubr.f32.mxu0 %v626_v1  ;;  %2097 = vmatpush1.bf16.msra.mxu0 %v2096_v0 }
  0xf1   : > { %1031 = vmatmul.mubr.f32.gmra.mrb[12].mxu1 %v621_v57  ;;  %2099 = vmatprep.subr.bf16.mxu0 %v2098_v19  ;;  %v1437_v57 = vld [vmem:[%s2906_s18 + $0x1d0] sm:$0xff] }
  0xf2   : > { %1036 = vmatprep.mubr.f32.mxu1 %v624_v59  ;;  %2152 = vmatpush1.bf16.msra.mxu1 %v2092_v58  ;;  %v2124_v58 = vpack.c.bf16 %v1437_v57, %v1435_v56  ;;  %v1440_v59 = vld [vmem:[%s2906_s18 + $0x1e8] sm:$0xff] }
  0xf3   : > { %818 = vmatmul.mubr.f32.gmra.mrb[16].mxu0 %v625_v2  ;;  %2137 = vmatprep.subr.bf16.mxu1 %v2094_v60  ;;  %v1442_v60 = vld [vmem:[%s2906_s18 + $0x1f8] sm:$0xff] }
  0xf4   : > { %823 = vmatprep.mubr.f32.mxu0 %v628_v3  ;;  %2101 = vmatpush1.bf16.msra.mxu0 %v2100_v22  ;;  %v2126_v61 = vpack.c.bf16 %v1442_v60, %v1440_v59 }
  0xf5   : > { %1037 = vmatmul.mubr.f32.gmra.mrb[14].mxu1 %v623_v63  ;;  %2103 = vmatprep.subr.bf16.mxu0 %v2102_v25  ;;  %v1441_v63 = vld [vmem:[%s2906_s18 + $0x1f0] sm:$0xff] }
  0xf6   : > { %1042 = vmatprep.mubr.f32.mxu1 %v626_v1  ;;  %2153 = vmatpush1.bf16.msra.mxu1 %v2096_v0  ;;  %v2128_v0 = vpack.c.bf16 %v1441_v63, %v1439_v62 }
  0xf7   : > { %824 = vmatmul.mubr.f32.gmra.mrb[18].mxu0 %v627_v4  ;;  %2138 = vmatprep.subr.bf16.mxu1 %v2098_v19 }
  0xf8   : > { %829 = vmatprep.mubr.f32.mxu0 %v630_v5  ;;  %2105 = vmatpush1.bf16.msra.mxu0 %v2104_v28 }
  0xf9   : > { %1043 = vmatmul.mubr.f32.gmra.mrb[16].mxu1 %v625_v2  ;;  %2107 = vmatprep.subr.bf16.mxu0 %v2106_v31 }
  0xfa   : > { %1048 = vmatprep.mubr.f32.mxu1 %v628_v3  ;;  %2154 = vmatpush1.bf16.msra.mxu1 %v2100_v22 }
  0xfb   : > { %830 = vmatmul.mubr.f32.gmra.mrb[20].mxu0 %v629_v6  ;;  %2139 = vmatprep.subr.bf16.mxu1 %v2102_v25 }
  0xfc   : > { %835 = vmatprep.mubr.f32.mxu0 %v632_v7  ;;  %2109 = vmatpush1.bf16.msra.mxu0 %v2108_v34 }
  0xfd   : > { %1049 = vmatmul.mubr.f32.gmra.mrb[18].mxu1 %v627_v4  ;;  %2111 = vmatprep.subr.bf16.mxu0 %v2110_v37 }
  0xfe   : > { %1054 = vmatprep.mubr.f32.mxu1 %v630_v5  ;;  %2155 = vmatpush1.bf16.msra.mxu1 %v2104_v28 }
  0xff   : > { %836 = vmatmul.mubr.f32.gmra.mrb[22].mxu0 %v631_v8  ;;  %2140 = vmatprep.subr.bf16.mxu1 %v2106_v31 }
 0x100   : > { %841 = vmatprep.mubr.f32.mxu0 %v634_v9  ;;  %2113 = vmatpush1.bf16.msra.mxu0 %v2112_v40 }
 0x101   : > { %1055 = vmatmul.mubr.f32.gmra.mrb[20].mxu1 %v629_v6  ;;  %2115 = vmatprep.subr.bf16.mxu0 %v2114_v43 }
 0x102   : > { %1060 = vmatprep.mubr.f32.mxu1 %v632_v7  ;;  %2156 = vmatpush1.bf16.msra.mxu1 %v2108_v34 }
 0x103   : > { %842 = vmatmul.mubr.f32.gmra.mrb[24].mxu0 %v633_v10  ;;  %2141 = vmatprep.subr.bf16.mxu1 %v2110_v37 }
 0x104   : > { %847 = vmatprep.mubr.f32.mxu0 %v636_v11  ;;  %2117 = vmatpush1.bf16.msra.mxu0 %v2116_v46 }
 0x105   : > { %1061 = vmatmul.mubr.f32.gmra.mrb[22].mxu1 %v631_v8  ;;  %2119 = vmatprep.subr.bf16.mxu0 %v2118_v49 }
 0x106   : > { %1066 = vmatprep.mubr.f32.mxu1 %v634_v9  ;;  %2157 = vmatpush1.bf16.msra.mxu1 %v2112_v40 }
 0x107   : > { %848 = vmatmul.mubr.f32.gmra.mrb[26].mxu0 %v635_v12  ;;  %2142 = vmatprep.subr.bf16.mxu1 %v2114_v43 }
 0x108   : > { %853 = vmatprep.mubr.f32.mxu0 %v638_v13  ;;  %2121 = vmatpush1.bf16.msra.mxu0 %v2120_v52 }
 0x109   : > { %1067 = vmatmul.mubr.f32.gmra.mrb[24].mxu1 %v633_v10  ;;  %2123 = vmatprep.subr.bf16.mxu0 %v2122_v55 }
 0x10a   : > { %1072 = vmatprep.mubr.f32.mxu1 %v636_v11  ;;  %2158 = vmatpush1.bf16.msra.mxu1 %v2116_v46 }
 0x10b   : > { %854 = vmatmul.mubr.f32.gmra.mrb[28].mxu0 %v637_v14  ;;  %2143 = vmatprep.subr.bf16.mxu1 %v2118_v49 }
 0x10c   : > { %859 = vmatprep.mubr.f32.mxu0 %v640_v15  ;;  %2125 = vmatpush1.bf16.msra.mxu0 %v2124_v58 }
 0x10d   : > { %1073 = vmatmul.mubr.f32.gmra.mrb[26].mxu1 %v635_v12  ;;  %2127 = vmatprep.subr.bf16.mxu0 %v2126_v61 }
 0x10e   : > { %1078 = vmatprep.mubr.f32.mxu1 %v638_v13  ;;  %2159 = vmatpush1.bf16.msra.mxu1 %v2120_v52 }
 0x10f   : > { %860 = vmatmul.mubr.f32.gmra.mrb[30].mxu0 %v639_v16  ;;  %2144 = vmatprep.subr.bf16.mxu1 %v2122_v55 }
 0x110   : > { %2129 = vmatpush1.bf16.msra.mxu0 %v2128_v0 }
 0x111   : > { %1079 = vmatmul.mubr.f32.gmra.mrb[28].mxu1 %v637_v14 }
 0x112   : > { %1084 = vmatprep.mubr.f32.mxu1 %v640_v15  ;;  %2160 = vmatpush1.bf16.msra.mxu1 %v2124_v58 }
 0x113   : > { %2145 = vmatprep.subr.bf16.mxu1 %v2126_v61 }
 0x115   : > { %1085 = vmatmul.mubr.f32.gmra.mrb[30].mxu1 %v639_v16 }
 0x116   : > { %2161 = vmatpush1.bf16.msra.mxu1 %v2128_v0 }
 0x1a6   : > { %v3139_v1 = vpop.f32.mrb[0].mxu0 }
 0x1a7   : > { %v1893_v2 = vmul.f32 -1.442695, %v3139_v1  ;;  %v3142_v3 = vpop.f32.mrb[1].mxu0 }
 0x1a8   : > { %v1894_v4 = vmul.f32 -1.442695, %v3142_v3 }
 0x1a9   : > { %2252 = vpow2.f32 %v1893_v2 }
 0x1aa   : > { %2254 = vpow2.f32 %v1894_v4  ;;  %v3145_v5 = vpop.f32.mrb[2].mxu0 }
 0x1ab   : > { %v1895_v6 = vmul.f32 -1.442695, %v3145_v5  ;;  %v3148_v7 = vpop.f32.mrb[3].mxu0 }
 0x1ac   : > { %v1896_v8 = vmul.f32 -1.442695, %v3148_v7  ;;  %v3157_v13 = vpop.f32.mrb[0].mxu1 }
 0x1ad   : > { %2256 = vpow2.f32 %v1895_v6  ;;  %v3159_v14 = vpop.f32.mrb[1].mxu1 }
 0x1ae   : > { %2258 = vpow2.f32 %v1896_v8  ;;  %v3151_v9 = vpop.f32.mrb[4].mxu0 }
 0x1af   : > { %v1897_v10 = vmul.f32 -1.442695, %v3151_v9  ;;  %v3154_v11 = vpop.f32.mrb[5].mxu0 }
 0x1b0   : > { %v1898_v12 = vmul.f32 -1.442695, %v3154_v11  ;;  %v3167_v22 = vpop.f32.mrb[2].mxu1 }
 0x1b1   : > { %2260 = vpow2.f32 %v1897_v10  ;;  %v3169_v24 = vpop.f32.mrb[3].mxu1 }
 0x1b2   : > { %2262 = vpow2.f32 %v1898_v12  ;;  %v3161_v15 = vpop.f32.mrb[6].mxu0 }
 0x1b3   : > { %v2253_v16 = vpop.eup %2252  ;;  %v1899_v17 = vmul.f32 -1.442695, %v3161_v15  ;;  %v3164_v18 = vpop.f32.mrb[7].mxu0 }
 0x1b4   : > { %v2255_v19 = vpop.eup %2254  ;;  %v1187_v20 = vadd.f32 1.0, %v2253_v16  ;;  %v1900_v21 = vmul.f32 -1.442695, %v3164_v18  ;;  %v3177_v32 = vpop.f32.mrb[4].mxu1 }
 0x1b5   : > { %v1188_v23 = vadd.f32 1.0, %v2255_v19  ;;  %2264 = vpow2.f32 %v1899_v17  ;;  %v3179_v34 = vpop.f32.mrb[5].mxu1 }
 0x1b6   : > { %2266 = vrcp.f32 %v1187_v20  ;;  %v3171_v25 = vpop.f32.mrb[8].mxu0 }
 0x1b7   : > { %v2257_v26 = vpop.eup %2256  ;;  %2268 = vrcp.f32 %v1188_v23  ;;  %v1901_v27 = vmul.f32 -1.442695, %v3171_v25  ;;  %v3174_v28 = vpop.f32.mrb[9].mxu0 }
 0x1b8   : > { %v2259_v29 = vpop.eup %2258  ;;  %v1189_v30 = vadd.f32 1.0, %v2257_v26  ;;  %2270 = vpow2.f32 %v1900_v21  ;;  %v1902_v31 = vmul.f32 -1.442695, %v3174_v28  ;;  %v3187_v42 = vpop.f32.mrb[6].mxu1 }
 0x1b9   : > { %v1190_v33 = vadd.f32 1.0, %v2259_v29  ;;  %2272 = vpow2.f32 %v1901_v27  ;;  %v3189_v44 = vpop.f32.mrb[7].mxu1 }
 0x1ba   : > { %2274 = vrcp.f32 %v1189_v30  ;;  %v3181_v35 = vpop.f32.mrb[10].mxu0 }
 0x1bb   : > { %v2261_v36 = vpop.eup %2260  ;;  %2276 = vrcp.f32 %v1190_v33  ;;  %v1903_v37 = vmul.f32 -1.442695, %v3181_v35  ;;  %v3184_v38 = vpop.f32.mrb[11].mxu0 }
 0x1bc   : > { %v2263_v39 = vpop.eup %2262  ;;  %v1191_v40 = vadd.f32 1.0, %v2261_v36  ;;  %2278 = vpow2.f32 %v1902_v31  ;;  %v1904_v41 = vmul.f32 -1.442695, %v3184_v38  ;;  %v3197_v52 = vpop.f32.mrb[8].mxu1 }
 0x1bd   : > { %v1192_v43 = vadd.f32 1.0, %v2263_v39  ;;  %2280 = vpow2.f32 %v1903_v37  ;;  %v3200_v55 = vpop.f32.mrb[9].mxu1 }
 0x1be   : > { %2282 = vrcp.f32 %v1191_v40  ;;  %v3191_v45 = vpop.f32.mrb[12].mxu0 }
 0x1bf   : > { %v2265_v46 = vpop.eup %2264  ;;  %2284 = vrcp.f32 %v1192_v43  ;;  %v1905_v47 = vmul.f32 -1.442695, %v3191_v45  ;;  %v3194_v48 = vpop.f32.mrb[13].mxu0 }
 0x1c0   : > { %v2267_v49 = vpop.eup %2266  ;;  %v1193_v50 = vadd.f32 1.0, %v2265_v46  ;;  %2286 = vpow2.f32 %v1904_v41  ;;  %v1906_v51 = vmul.f32 -1.442695, %v3194_v48  ;;  %v3211_v6 = vpop.f32.mrb[10].mxu1 }
 0x1c1   : > { %v2269_v53 = vpop.eup %2268  ;;  %v1283_v54 = vmul.f32 %v2267_v49, %v3139_v1  ;;  %2288 = vpow2.f32 %v1905_v47  ;;  %v3214_v10 = vpop.f32.mrb[11].mxu1 }
 0x1c2   : > { %v2271_v56 = vpop.eup %2270  ;;  %v1284_v57 = vmul.f32 %v2269_v53, %v3142_v3  ;;  %2290 = vrcp.f32 %v1193_v50  ;;  %v3203_v58 = vpop.f32.mrb[14].mxu0 }
 0x1c3   : > { %v2273_v59 = vpop.eup %2272  ;;  %v1194_v60 = vadd.f32 1.0, %v2271_v56  ;;  %2292 = vpow2.f32 %v1906_v51  ;;  %v1315_v61 = vmul.f32 %v1283_v54, %v3157_v13  ;;  %v1907_v62 = vmul.f32 -1.442695, %v3203_v58  ;;  %v3207_v63 = vpop.f32.mrb[15].mxu0 }
 0x1c4   : > { %v2275_v0 = vpop.eup %2274  ;;  %v1195_v1 = vadd.f32 1.0, %v2273_v59  ;;  %v1316_v2 = vmul.f32 %v1284_v57, %v3159_v14  ;;  %v1908_v4 = vmul.f32 -1.442695, %v3207_v63  ;;  %v3225_v27 = vpop.f32.mrb[12].mxu1 }
 0x1c5   : > { %v2277_v3 = vpop.eup %2276  ;;  %v1285_v8 = vmul.f32 %v2275_v0, %v3145_v5  ;;  %2294 = vrcp.f32 %v1194_v60  ;;  %v3228_v31 = vpop.f32.mrb[13].mxu1 }
 0x1c6   : > { %v2279_v12 = vpop.eup %2278  ;;  %v1286_v13 = vmul.f32 %v2277_v3, %v3148_v7  ;;  %2296 = vrcp.f32 %v1195_v1  ;;  %v3217_v16 = vpop.f32.mrb[16].mxu0  ;;  %1507 = vmatprep.mubr.f32.mxu0 %v1316_v2 }
 0x1c7   : > { %v2281_v17 = vpop.eup %2280  ;;  %v1196_v19 = vadd.f32 1.0, %v2279_v12  ;;  %2298 = vpow2.f32 %v1907_v62  ;;  %v1317_v14 = vmul.f32 %v1285_v8, %v3167_v22  ;;  %v1909_v20 = vmul.f32 -1.442695, %v3217_v16  ;;  %v3221_v21 = vpop.f32.mrb[17].mxu0  ;;  %1508 = vmatmul.mubr.f32.vlgmr.msra.gmra.mrb[32].mxu0 %v1315_v61 }
 0x1c8   : > { %v2283_v5 = vpop.eup %2282  ;;  %v1197_v23 = vadd.f32 1.0, %v2281_v17  ;;  %2300 = vpow2.f32 %v1908_v4  ;;  %v1318_v26 = vmul.f32 %v1286_v13, %v3169_v24  ;;  %v1910_v7 = vmul.f32 -1.442695, %v3221_v21 }
 0x1c9   : > { %v2285_v29 = vpop.eup %2284  ;;  %v1287_v30 = vmul.f32 %v2283_v5, %v3151_v9  ;;  %2302 = vrcp.f32 %v1196_v19 }
 0x1ca   : > { %v2287_v22 = vpop.eup %2286  ;;  %v1288_v33 = vmul.f32 %v2285_v29, %v3154_v11  ;;  %2304 = vrcp.f32 %v1197_v23  ;;  %v3231_v36 = vpop.f32.mrb[18].mxu0  ;;  %1513 = vmatprep.mubr.f32.mxu0 %v1318_v26 }
 0x1cb   : > { %v2289_v37 = vpop.eup %2288  ;;  %v1198_v39 = vadd.f32 1.0, %v2287_v22  ;;  %2306 = vpow2.f32 %v1909_v20  ;;  %v1319_v24 = vmul.f32 %v1287_v30, %v3177_v32  ;;  %v1911_v40 = vmul.f32 -1.442695, %v3231_v36  ;;  %v3235_v41 = vpop.f32.mrb[19].mxu0  ;;  %1514 = vmatmul.mubr.f32.gmra.mrb[34].mxu0 %v1317_v14 }
 0x1cc   : > { %v2291_v9 = vpop.eup %2290  ;;  %v1199_v43 = vadd.f32 1.0, %v2289_v37  ;;  %2308 = vpow2.f32 %v1910_v7  ;;  %v1320_v46 = vmul.f32 %v1288_v33, %v3179_v34  ;;  %v3238_v11 = vpop.f32.mrb[14].mxu1  ;;  %v1912_v50 = vmul.f32 -1.442695, %v3235_v41 }
 0x1cd   : > { %v2293_v47 = vpop.eup %2292  ;;  %v1289_v49 = vmul.f32 %v2291_v9, %v3161_v15  ;;  %2310 = vrcp.f32 %v1198_v39  ;;  %v3242_v51 = vpop.f32.mrb[15].mxu1 }
 0x1ce   : > { %2312 = vrcp.f32 %v1199_v43  ;;  %v1200_v32 = vadd.f32 1.0, %v2293_v47  ;;  %v3244_v53 = vpop.f32.mrb[20].mxu0  ;;  %1519 = vmatprep.mubr.f32.mxu0 %v1320_v46  ;;  %v3252_v61 = vpop.f32.mrb[16].mxu1 }
 0x1cf   : > { %v2295_v54 = vpop.eup %2294  ;;  %2314 = vpow2.f32 %v1911_v40  ;;  %v1321_v56 = vmul.f32 %v1289_v49, %v3187_v42  ;;  %v1913_v34 = vmul.f32 -1.442695, %v3244_v53  ;;  %v3248_v57 = vpop.f32.mrb[21].mxu0  ;;  %1520 = vmatmul.mubr.f32.gmra.mrb[36].mxu0 %v1319_v24 }
 0x1d0   : > { %v2297_v15 = vpop.eup %2296  ;;  %v1290_v59 = vmul.f32 %v2295_v54, %v3164_v18  ;;  %2316 = vrcp.f32 %v1200_v32  ;;  %v1914_v60 = vmul.f32 -1.442695, %v3248_v57  ;;  %v3255_v1 = vpop.f32.mrb[17].mxu1 }
 0x1d1   : > { %v2299_v62 = vpop.eup %2298  ;;  %v1291_v0 = vmul.f32 %v2297_v15, %v3171_v25  ;;  %2318 = vpow2.f32 %v1912_v50  ;;  %v3266_v20 = vpop.f32.mrb[18].mxu1 }
 0x1d2   : > { %v2301_v42 = vpop.eup %2300  ;;  %v1201_v2 = vadd.f32 1.0, %v2299_v62  ;;  %2320 = vpow2.f32 %v1913_v34  ;;  %v1322_v4 = vmul.f32 %v1290_v59, %v3189_v44  ;;  %v3258_v3 = vpop.f32.mrb[22].mxu0 }
 0x1d3   : > { %v2303_v8 = vpop.eup %2302  ;;  %v1202_v18 = vadd.f32 1.0, %v2301_v42  ;;  %2322 = vpow2.f32 %v1914_v60  ;;  %v1323_v12 = vmul.f32 %v1291_v0, %v3197_v52  ;;  %v1915_v13 = vmul.f32 -1.442695, %v3258_v3  ;;  %v3262_v17 = vpop.f32.mrb[23].mxu0 }
 0x1d4   : > { %v2305_v25 = vpop.eup %2304  ;;  %v1292_v19 = vmul.f32 %v2303_v8, %v3174_v28  ;;  %2324 = vrcp.f32 %v1201_v2  ;;  %1525 = vmatprep.mubr.f32.mxu0 %v1322_v4  ;;  %v1916_v14 = vmul.f32 -1.442695, %v3262_v17  ;;  %v3269_v23 = vpop.f32.mrb[19].mxu1 }
 0x1d5   : > { %v2307_v44 = vpop.eup %2306  ;;  %v1293_v5 = vmul.f32 %v2305_v25, %v3181_v35  ;;  %2326 = vrcp.f32 %v1202_v18  ;;  %1526 = vmatmul.mubr.f32.gmra.mrb[38].mxu0 %v1321_v56  ;;  %v3280_v40 = vpop.f32.mrb[20].mxu1 }
 0x1d6   : > { %v2309_v52 = vpop.eup %2308  ;;  %v1203_v26 = vadd.f32 1.0, %v2307_v44  ;;  %2328 = vpow2.f32 %v1915_v13  ;;  %v1324_v7 = vmul.f32 %v1292_v19, %v3200_v55  ;;  %v3272_v29 = vpop.f32.mrb[24].mxu0 }
 0x1d7   : > { %v2311_v28 = vpop.eup %2310  ;;  %v1204_v30 = vadd.f32 1.0, %v2309_v52  ;;  %2330 = vpow2.f32 %v1916_v14  ;;  %v1325_v22 = vmul.f32 %v1293_v5, %v3211_v6  ;;  %v1917_v33 = vmul.f32 -1.442695, %v3272_v29  ;;  %v3276_v37 = vpop.f32.mrb[25].mxu0 }
 0x1d8   : > { %v2313_v35 = vpop.eup %2312  ;;  %v1294_v39 = vmul.f32 %v2311_v28, %v3184_v38  ;;  %2332 = vrcp.f32 %v1203_v26  ;;  %1531 = vmatprep.mubr.f32.mxu0 %v1324_v7  ;;  %v1918_v24 = vmul.f32 -1.442695, %v3276_v37  ;;  %v3283_v43 = vpop.f32.mrb[21].mxu1 }
 0x1d9   : > { %v2315_v55 = vpop.eup %2314  ;;  %v1295_v9 = vmul.f32 %v2313_v35, %v3191_v45  ;;  %2334 = vrcp.f32 %v1204_v30  ;;  %1532 = vmatmul.mubr.f32.gmra.mrb[40].mxu0 %v1323_v12  ;;  %v3293_v15 = vpop.f32.mrb[22].mxu1 }
 0x1da   : > { %v2317_v6 = vpop.eup %2316  ;;  %v1205_v46 = vadd.f32 1.0, %v2315_v55  ;;  %2336 = vpow2.f32 %v1917_v33  ;;  %v1326_v47 = vmul.f32 %v1294_v39, %v3214_v10  ;;  %v3286_v49 = vpop.f32.mrb[26].mxu0 }
 0x1db   : > { %v2319_v38 = vpop.eup %2318  ;;  %v1296_v50 = vmul.f32 %v2317_v6, %v3194_v48  ;;  %2338 = vpow2.f32 %v1918_v24  ;;  %v1327_v32 = vmul.f32 %v1295_v9, %v3225_v27  ;;  %v1919_v54 = vmul.f32 -1.442695, %v3286_v49  ;;  %v3291_v45 = vpop.f32.mrb[27].mxu0 }
 0x1dc   : > { %v2321_v56 = vpop.eup %2320  ;;  %2340 = vrcp.f32 %v1205_v46  ;;  %v1206_v34 = vadd.f32 1.0, %v2319_v38  ;;  %1537 = vmatprep.mubr.f32.mxu0 %v1326_v47  ;;  %v1920_v48 = vmul.f32 -1.442695, %v3291_v45  ;;  %v3297_v62 = vpop.f32.mrb[23].mxu1 }
 0x1dd   : > { %v2323_v59 = vpop.eup %2322  ;;  %v1207_v10 = vadd.f32 1.0, %v2321_v56  ;;  %2342 = vpow2.f32 %v1919_v54  ;;  %v1328_v60 = vmul.f32 %v1296_v50, %v3228_v31  ;;  %1538 = vmatmul.mubr.f32.gmra.mrb[42].mxu0 %v1325_v22  ;;  %v3306_v13 = vpop.f32.mrb[24].mxu1 }
 0x1de   : > { %v2325_v27 = vpop.eup %2324  ;;  %2344 = vrcp.f32 %v1206_v34  ;;  %v1208_v0 = vadd.f32 1.0, %v2323_v59  ;;  %v3299_v42 = vpop.f32.mrb[28].mxu0 }
 0x1df   : > { %v2327_v2 = vpop.eup %2326  ;;  %v1297_v4 = vmul.f32 %v2325_v27, %v3203_v58  ;;  %2346 = vrcp.f32 %v1207_v10  ;;  %v1921_v8 = vmul.f32 -1.442695, %v3299_v42  ;;  %1543 = vmatprep.mubr.f32.mxu0 %v1328_v60  ;;  %v3303_v18 = vpop.f32.mrb[29].mxu0 }
 0x1e0   : > { %v2329_v31 = vpop.eup %2328  ;;  %v1298_v12 = vmul.f32 %v2327_v2, %v3207_v63  ;;  %2348 = vrcp.f32 %v1208_v0  ;;  %v1922_v44 = vmul.f32 -1.442695, %v3303_v18  ;;  %v3310_v58 = vpop.f32.mrb[25].mxu1 }
 0x1e1   : > { %v2331_v25 = vpop.eup %2330  ;;  %v1209_v19 = vadd.f32 1.0, %v2329_v31  ;;  %2350 = vpow2.f32 %v1920_v48  ;;  %v1329_v14 = vmul.f32 %v1297_v4, %v3238_v11  ;;  %1544 = vmatmul.mubr.f32.gmra.mrb[44].mxu0 %v1327_v32  ;;  %v3320_v35 = vpop.f32.mrb[26].mxu1 }
 0x1e2   : > { %v2333_v5 = vpop.eup %2332  ;;  %v1210_v52 = vadd.f32 1.0, %v2331_v25  ;;  %2352 = vpow2.f32 %v1921_v8  ;;  %v1330_v26 = vmul.f32 %v1298_v12, %v3242_v51  ;;  %v3313_v7 = vpop.f32.mrb[30].mxu0 }
 0x1e3   : > { %v2335_v63 = vpop.eup %2334  ;;  %v1299_v28 = vmul.f32 %v2333_v5, %v3217_v16  ;;  %2354 = vrcp.f32 %v1209_v19  ;;  %v1923_v30 = vmul.f32 -1.442695, %v3313_v7  ;;  %v3317_v22 = vpop.f32.mrb[31].mxu0 }
 0x1e4   : > { %v2337_v11 = vpop.eup %2336  ;;  %v1300_v33 = vmul.f32 %v2335_v63, %v3221_v21  ;;  %2356 = vrcp.f32 %v1210_v52  ;;  %1549 = vmatprep.mubr.f32.mxu0 %v1330_v26  ;;  %v1924_v55 = vmul.f32 -1.442695, %v3317_v22  ;;  %v3324_v16 = vpop.f32.mrb[27].mxu1 }
 0x1e5   : > { %v2339_v39 = vpop.eup %2338  ;;  %v1211_v24 = vadd.f32 1.0, %v2337_v11  ;;  %2358 = vpow2.f32 %v1922_v44  ;;  %v1331_v51 = vmul.f32 %v1299_v28, %v3252_v61  ;;  %1550 = vmatmul.mubr.f32.gmra.mrb[46].mxu0 %v1329_v14  ;;  %v1080_v32 = vpop.f32.mrb[28].mxu1 }
 0x1e6   : > { %v2341_v9 = vpop.eup %2340  ;;  %v1212_v6 = vadd.f32 1.0, %v2339_v39  ;;  %2360 = vpow2.f32 %v1923_v30  ;;  %v1332_v46 = vmul.f32 %v1300_v33, %v3255_v1  ;;  %v1082_v34 = vpop.f32.mrb[29].mxu1 }
 0x1e7   : > { %v2343_v21 = vpop.eup %2342  ;;  %v1301_v47 = vmul.f32 %v2341_v9, %v3231_v36  ;;  %2362 = vrcp.f32 %v1211_v24 }
 0x1e8   : > { %v2345_v38 = vpop.eup %2344  ;;  %2364 = vrcp.f32 %v1212_v6  ;;  %v1213_v50 = vadd.f32 1.0, %v2343_v21  ;;  %1555 = vmatprep.mubr.f32.mxu1 %v1332_v46  ;;  %v1086_v2 = vpop.f32.mrb[30].mxu1 }
 0x1e9   : > { %v2347_v61 = vpop.eup %2346  ;;  %v1302_v54 = vmul.f32 %v2345_v38, %v3235_v41  ;;  %2366 = vpow2.f32 %v1924_v55  ;;  %v1333_v56 = vmul.f32 %v1301_v47, %v3266_v20  ;;  %1556 = vmatmul.mubr.f32.vlgmr.msra.gmra.mrb[32].mxu1 %v1331_v51  ;;  %v1088_v8 = vpop.f32.mrb[31].mxu1  ;;  %v1349_v47 = vld [vmem:[#allocation2 + $0x10] sm:$0xff] }
 0x1ea   : > { %v2349_v59 = vpop.eup %2348  ;;  %v1303_v1 = vmul.f32 %v2347_v61, %v3244_v53  ;;  %2368 = vrcp.f32 %v1213_v50 }
 0x1eb   : > { %v2351_v10 = vpop.eup %2350  ;;  %v1304_v36 = vmul.f32 %v2349_v59, %v3248_v57  ;;  %v1334_v60 = vmul.f32 %v1302_v54, %v3269_v23  ;;  %v1352_v54 = vld [vmem:[#allocation2 + $0x28] sm:$0xff] }
 0x1ec   : > { %v2353_v48 = vpop.eup %2352  ;;  %v1214_v27 = vadd.f32 1.0, %v2351_v10  ;;  %v1335_v0 = vmul.f32 %v1303_v1, %v3280_v40  ;;  %v1353_v10 = vld [vmem:[#allocation2 + $0x30] sm:$0xff] }
 0x1ed   : > { %v2355_v41 = vpop.eup %2354  ;;  %v1215_v4 = vadd.f32 1.0, %v2353_v48  ;;  %v1336_v20 = vmul.f32 %v1304_v36, %v3283_v43  ;;  %1561 = vmatprep.mubr.f32.mxu1 %v1334_v60  ;;  %v1354_v36 = vld [vmem:[#allocation2 + $0x38] sm:$0xff] }
 0x1ee   : > { %v2357_v31 = vpop.eup %2356  ;;  %v1305_v53 = vmul.f32 %v2355_v41, %v3258_v3  ;;  %2370 = vrcp.f32 %v1214_v27  ;;  %1562 = vmatmul.mubr.f32.gmra.mrb[34].mxu1 %v1333_v56  ;;  %v1356_v41 = vld [vmem:[#allocation2 + $0x48] sm:$0xff] }
 0x1ef   : > { %v2359_v12 = vpop.eup %2358  ;;  %v1306_v57 = vmul.f32 %v2357_v31, %v3262_v17  ;;  %2372 = vrcp.f32 %v1215_v4  ;;  %1567 = vmatprep.mubr.f32.mxu1 %v1336_v20 }
 0x1f0   : > { %v2361_v23 = vpop.eup %2360  ;;  %v1216_v25 = vadd.f32 1.0, %v2359_v12  ;;  %v1337_v40 = vmul.f32 %v1305_v53, %v3293_v15  ;;  %v1357_v53 = vld [vmem:[#allocation2 + $0x50] sm:$0xff]  ;;  %v1358_v12 = vld [vmem:[#allocation2 + $0x58] sm:$0xff] }
 0x1f1   : > { %v2363_v19 = vpop.eup %2362  ;;  %v1217_v14 = vadd.f32 1.0, %v2361_v23  ;;  %v1338_v43 = vmul.f32 %v1306_v57, %v3297_v62 }
 0x1f2   : > { %v2365_v44 = vpop.eup %2364  ;;  %v1307_v5 = vmul.f32 %v2363_v19, %v3272_v29  ;;  %2374 = vrcp.f32 %v1216_v25  ;;  %1568 = vmatmul.mubr.f32.gmra.mrb[36].mxu1 %v1335_v0  ;;  %v1359_v19 = vld [vmem:[#allocation2 + $0x60] sm:$0xff] }
 0x1f3   : > { %v2367_v3 = vpop.eup %2366  ;;  %v1308_v52 = vmul.f32 %v2365_v44, %v3276_v37  ;;  %2376 = vrcp.f32 %v1217_v14  ;;  %1573 = vmatprep.mubr.f32.mxu1 %v1338_v43  ;;  %v1360_v14 = vld [vmem:[#allocation2 + $0x68] sm:$0xff] }
 0x1f4   : > { %v2369_v17 = vpop.eup %2368  ;;  %v1218_v26 = vadd.f32 1.0, %v2367_v3  ;;  %v1339_v63 = vmul.f32 %v1307_v5, %v3306_v13 }
 0x1f5   : > { %v1309_v15 = vmul.f32 %v2369_v17, %v3286_v49  ;;  %v1340_v28 = vmul.f32 %v1308_v52, %v3310_v58  ;;  %v1361_v52 = vld [vmem:[#allocation2 + $0x70] sm:$0xff]  ;;  %v1362_v17 = vld [vmem:[#allocation2 + $0x78] sm:$0xff] }
 0x1f6   : > { %2378 = vrcp.f32 %v1218_v26  ;;  %1574 = vmatmul.mubr.f32.gmra.mrb[38].mxu1 %v1337_v40 }
 0x1f7   : > { %v1341_v62 = vmul.f32 %v1309_v15, %v3320_v35  ;;  %1579 = vmatprep.mubr.f32.mxu1 %v1340_v28 }
 0x1f8   : > { %v2371_v29 = vpop.eup %2370 }
 0x1f9   : > { %v2373_v30 = vpop.eup %2372  ;;  %v1310_v11 = vmul.f32 %v2371_v29, %v3291_v45  ;;  %v1364_v29 = vld [vmem:[#allocation2 + $0x88] sm:$0xff] }
 0x1fa   : > { %v1311_v37 = vmul.f32 %v2373_v30, %v3299_v42  ;;  %1580 = vmatmul.mubr.f32.gmra.mrb[40].mxu1 %v1339_v63  ;;  %v1347_v42 = vld [vmem:[#allocation2] sm:$0xff] }
 0x1fb   : > { %v1342_v33 = vmul.f32 %v1310_v11, %v3324_v16  ;;  %v1348_v16 = vld [vmem:[#allocation2 + $0x8] sm:$0xff] }
 0x1fc   : > { %v2375_v39 = vpop.eup %2374  ;;  %v1343_v13 = vmul.f32 %v1311_v37, %v1080_v32 }
 0x1fd   : > { %v2377_v24 = vpop.eup %2376  ;;  %v1312_v49 = vmul.f32 %v2375_v39, %v3303_v18  ;;  %1585 = vmatprep.mubr.f32.mxu1 %v1342_v33  ;;  %v1365_v39 = vld [vmem:[#allocation2 + $0x90] sm:$0xff] }
 0x1fe   : > { %v1313_v58 = vmul.f32 %v2377_v24, %v3313_v7  ;;  %1586 = vmatmul.mubr.f32.gmra.mrb[42].mxu1 %v1341_v62  ;;  %v1350_v7 = vld [vmem:[#allocation2 + $0x18] sm:$0xff]  ;;  %v1363_v62 = vld [vmem:[#allocation2 + $0x80] sm:$0xff] }
 0x1ff   : > { %v1344_v35 = vmul.f32 %v1312_v49, %v1082_v34 }
 0x200   : > { %v2379_v51 = vpop.eup %2378  ;;  %v1345_v55 = vmul.f32 %v1313_v58, %v1086_v2  ;;  %v1355_v2 = vld [vmem:[#allocation2 + $0x40] sm:$0xff] }
 0x201   : > { %v1314_v9 = vmul.f32 %v2379_v51, %v3317_v22  ;;  %1591 = vmatprep.mubr.f32.mxu1 %v1344_v35  ;;  %v1351_v22 = vld [vmem:[#allocation2 + $0x20] sm:$0xff] }
 0x202   : > { %1592 = vmatmul.mubr.f32.gmra.mrb[44].mxu1 %v1343_v13  ;;  %v1366_v13 = vld [vmem:[#allocation2 + $0x98] sm:$0xff]  ;;  %v1367_v51 = vld [vmem:[#allocation2 + $0xa0] sm:$0xff] }
 0x203   : > { %v1346_v45 = vmul.f32 %v1314_v9, %v1088_v8 }
 0x205   : > { %1597 = vmatprep.mubr.f32.mxu1 %v1346_v45 }
 0x206   : > { %1598 = vmatmul.mubr.f32.gmra.mrb[46].mxu1 %v1345_v55  ;;  %v1368_v55 = vld [vmem:[#allocation2 + $0xa8] sm:$0xff] }
 0x29a   : > { %v1509_v6 = vpop.f32.mrb[32].mxu0 }
 0x29b   : > { %v1604_v46 = vadd.f32 %v1509_v6, %v1347_v42  ;;  %v1511_v21 = vpop.f32.mrb[33].mxu0  ;;  %v1369_v6 = vld [vmem:[#allocation2 + $0xb0] sm:$0xff] }
 0x29c   : > { %v1605_v18 = vadd.f32 %v1511_v21, %v1348_v16 }
 0x29d   : > { %1636 = vst [vmem:[#allocation2] sm:$0xff] %v1604_v46  ;;  %v1370_v46 = vld [vmem:[#allocation2 + $0xb8] sm:$0xff] }
 0x29e   : > { %1637 = vst [vmem:[#allocation2 + $0x8] sm:$0xff] %v1605_v18  ;;  %v1515_v38 = vpop.f32.mrb[34].mxu0 }
 0x29f   : > { %v1606_v50 = vadd.f32 %v1515_v38, %v1349_v47  ;;  %v1517_v32 = vpop.f32.mrb[35].mxu0  ;;  %v1371_v38 = vld [vmem:[#allocation2 + $0xc0] sm:$0xff] }
 0x2a0   : > { %v1607_v61 = vadd.f32 %v1517_v32, %v1350_v7 }
 0x2a1   : > { %1638 = vst [vmem:[#allocation2 + $0x10] sm:$0xff] %v1606_v50  ;;  %v1372_v50 = vld [vmem:[#allocation2 + $0xc8] sm:$0xff] }
 0x2a2   : > { %1639 = vst [vmem:[#allocation2 + $0x18] sm:$0xff] %v1607_v61  ;;  %v1521_v56 = vpop.f32.mrb[36].mxu0 }
 0x2a3   : > { %v1608_v34 = vadd.f32 %v1521_v56, %v1351_v22  ;;  %v1523_v59 = vpop.f32.mrb[37].mxu0  ;;  %v1373_v56 = vld [vmem:[#allocation2 + $0xd0] sm:$0xff] }
 0x2a4   : > { %v1609_v1 = vadd.f32 %v1523_v59, %v1352_v54 }
 0x2a5   : > { %1640 = vst [vmem:[#allocation2 + $0x20] sm:$0xff] %v1608_v34  ;;  %v1374_v34 = vld [vmem:[#allocation2 + $0xd8] sm:$0xff] }
 0x2a6   : > { %1641 = vst [vmem:[#allocation2 + $0x28] sm:$0xff] %v1609_v1 }
 0x2a8   : > { %v1527_v60 = vpop.f32.mrb[38].mxu0 }
 0x2a9   : > { %v1610_v48 = vadd.f32 %v1527_v60, %v1353_v10  ;;  %v1529_v27 = vpop.f32.mrb[39].mxu0  ;;  %v1375_v60 = vld [vmem:[#allocation2 + $0xe0] sm:$0xff] }
 0x2aa   : > { %v1611_v0 = vadd.f32 %v1529_v27, %v1354_v36 }
 0x2ab   : > { %1642 = vst [vmem:[#allocation2 + $0x30] sm:$0xff] %v1610_v48  ;;  %v1376_v48 = vld [vmem:[#allocation2 + $0xe8] sm:$0xff] }
 0x2ac   : > { %1643 = vst [vmem:[#allocation2 + $0x38] sm:$0xff] %v1611_v0  ;;  %v1533_v4 = vpop.f32.mrb[40].mxu0 }
 0x2ad   : > { %v1612_v20 = vadd.f32 %v1533_v4, %v1355_v2  ;;  %v1535_v8 = vpop.f32.mrb[41].mxu0  ;;  %v1377_v4 = vld [vmem:[#allocation2 + $0xf0] sm:$0xff] }
 0x2ae   : > { %v1613_v31 = vadd.f32 %v1535_v8, %v1356_v41 }
 0x2af   : > { %1644 = vst [vmem:[#allocation2 + $0x40] sm:$0xff] %v1612_v20  ;;  %v1378_v20 = vld [vmem:[#allocation2 + $0xf8] sm:$0xff] }
 0x2b0   : > { %1645 = vst [vmem:[#allocation2 + $0x48] sm:$0xff] %v1613_v31  ;;  %v1539_v57 = vpop.f32.mrb[42].mxu0 }
 0x2b1   : > { %v1614_v23 = vadd.f32 %v1539_v57, %v1357_v53  ;;  %v1541_v25 = vpop.f32.mrb[43].mxu0  ;;  %v1672_v57 = vld [vmem:[#allocation2] sm:$0xff] (!%p1925_p6) }
 0x2b2   : > { %v1615_v40 = vadd.f32 %v1541_v25, %v1358_v12  ;;  %v1674_v25 = vld [vmem:[#allocation2 + $0x10] sm:$0xff] (!%p1925_p6)  ;;  %1704 = vst [vmem:[%s2912_s27] sm:$0xff] (!%p1925_p6), %v1672_v57 }
 0x2b3   : > { %1646 = vst [vmem:[#allocation2 + $0x50] sm:$0xff] %v1614_v23  ;;  %v1673_v23 = vld [vmem:[#allocation2 + $0x8] sm:$0xff] (!%p1925_p6)  ;;  %1706 = vst [vmem:[%s2912_s27 + $0x10] sm:$0xff] (!%p1925_p6), %v1674_v25 }
 0x2b4   : > { %1647 = vst [vmem:[#allocation2 + $0x58] sm:$0xff] %v1615_v40  ;;  %v1545_v43 = vpop.f32.mrb[44].mxu0  ;;  %1705 = vst [vmem:[%s2912_s27 + $0x8] sm:$0xff] (!%p1925_p6), %v1673_v23  ;;  %v1675_v40 = vld [vmem:[#allocation2 + $0x18] sm:$0xff] (!%p1925_p6) }
 0x2b5   : > { %v1616_v44 = vadd.f32 %v1545_v43, %v1359_v19  ;;  %v1547_v5 = vpop.f32.mrb[45].mxu0  ;;  %v1676_v19 = vld [vmem:[#allocation2 + $0x20] sm:$0xff] (!%p1925_p6)  ;;  %1707 = vst [vmem:[%s2912_s27 + $0x18] sm:$0xff] (!%p1925_p6), %v1675_v40  ;;  %v1678_v43 = vld [vmem:[#allocation2 + $0x30] sm:$0xff] (!%p1925_p6) }
 0x2b6   : > { %v1617_v3 = vadd.f32 %v1547_v5, %v1360_v14  ;;  %v1677_v14 = vld [vmem:[#allocation2 + $0x28] sm:$0xff] (!%p1925_p6)  ;;  %1708 = vst [vmem:[%s2912_s27 + $0x20] sm:$0xff] (!%p1925_p6), %v1676_v19  ;;  %v1680_v5 = vld [vmem:[#allocation2 + $0x40] sm:$0xff] (!%p1925_p6)  ;;  %1710 = vst [vmem:[%s2912_s27 + $0x30] sm:$0xff] (!%p1925_p6), %v1678_v43 }
 0x2b7   : > { %1648 = vst [vmem:[#allocation2 + $0x60] sm:$0xff] %v1616_v44  ;;  %1709 = vst [vmem:[%s2912_s27 + $0x28] sm:$0xff] (!%p1925_p6), %v1677_v14  ;;  %v1679_v44 = vld [vmem:[#allocation2 + $0x38] sm:$0xff] (!%p1925_p6) }
 0x2b8   : > { %1649 = vst [vmem:[#allocation2 + $0x68] sm:$0xff] %v1617_v3  ;;  %v1551_v26 = vpop.f32.mrb[46].mxu0  ;;  %1711 = vst [vmem:[%s2912_s27 + $0x38] sm:$0xff] (!%p1925_p6), %v1679_v44  ;;  %v1681_v3 = vld [vmem:[#allocation2 + $0x48] sm:$0xff] (!%p1925_p6) }
 0x2b9   : > { %v1618_v63 = vadd.f32 %v1551_v26, %v1361_v52  ;;  %v1553_v15 = vpop.f32.mrb[47].mxu0  ;;  %1712 = vst [vmem:[%s2912_s27 + $0x40] sm:$0xff] (!%p1925_p6), %v1680_v5  ;;  %1713 = vst [vmem:[%s2912_s27 + $0x48] sm:$0xff] (!%p1925_p6), %v1681_v3 }
 0x2ba   : > { %v1619_v28 = vadd.f32 %v1553_v15, %v1362_v17  ;;  %v1682_v52 = vld [vmem:[#allocation2 + $0x50] sm:$0xff] (!%p1925_p6) }
 0x2bb   : > { %1650 = vst [vmem:[#allocation2 + $0x70] sm:$0xff] %v1618_v63  ;;  %v1683_v17 = vld [vmem:[#allocation2 + $0x58] sm:$0xff] (!%p1925_p6)  ;;  %1714 = vst [vmem:[%s2912_s27 + $0x50] sm:$0xff] (!%p1925_p6), %v1682_v52 }
 0x2bc   : > { %1651 = vst [vmem:[#allocation2 + $0x78] sm:$0xff] %v1619_v28  ;;  %v1557_v30 = vpop.f32.mrb[32].mxu1  ;;  %1715 = vst [vmem:[%s2912_s27 + $0x58] sm:$0xff] (!%p1925_p6), %v1683_v17 }
 0x2bd   : > { %v1620_v11 = vadd.f32 %v1557_v30, %v1363_v62  ;;  %v1559_v37 = vpop.f32.mrb[33].mxu1 }
 0x2be   : > { %v1621_v33 = vadd.f32 %v1559_v37, %v1364_v29  ;;  %v1684_v26 = vld [vmem:[#allocation2 + $0x60] sm:$0xff] (!%p1925_p6) }
 0x2bf   : > { %1652 = vst [vmem:[#allocation2 + $0x80] sm:$0xff] %v1620_v11  ;;  %v1685_v63 = vld [vmem:[#allocation2 + $0x68] sm:$0xff] (!%p1925_p6)  ;;  %1716 = vst [vmem:[%s2912_s27 + $0x60] sm:$0xff] (!%p1925_p6), %v1684_v26 }
 0x2c0   : > { %1653 = vst [vmem:[#allocation2 + $0x88] sm:$0xff] %v1621_v33  ;;  %1717 = vst [vmem:[%s2912_s27 + $0x68] sm:$0xff] (!%p1925_p6), %v1685_v63 }
 0x2c1   : > { %v1563_v24 = vpop.f32.mrb[34].mxu1 }
 0x2c2   : > { %v1622_v49 = vadd.f32 %v1563_v24, %v1365_v39  ;;  %v1565_v58 = vpop.f32.mrb[35].mxu1  ;;  %v1686_v15 = vld [vmem:[#allocation2 + $0x70] sm:$0xff] (!%p1925_p6) }
 0x2c3   : > { %v1623_v35 = vadd.f32 %v1565_v58, %v1366_v13  ;;  %1718 = vst [vmem:[%s2912_s27 + $0x70] sm:$0xff] (!%p1925_p6), %v1686_v15  ;;  %v1687_v28 = vld [vmem:[#allocation2 + $0x78] sm:$0xff] (!%p1925_p6) }
 0x2c4   : > { %1654 = vst [vmem:[#allocation2 + $0x90] sm:$0xff] %v1622_v49  ;;  %1719 = vst [vmem:[%s2912_s27 + $0x78] sm:$0xff] (!%p1925_p6), %v1687_v28 }
 0x2c5   : > { %1655 = vst [vmem:[#allocation2 + $0x98] sm:$0xff] %v1623_v35  ;;  %v1569_v9 = vpop.f32.mrb[36].mxu1 }
 0x2c6   : > { %v1624_v45 = vadd.f32 %v1569_v9, %v1367_v51  ;;  %v1571_v42 = vpop.f32.mrb[37].mxu1  ;;  %v1688_v62 = vld [vmem:[#allocation2 + $0x80] sm:$0xff] (!%p1925_p6) }
 0x2c7   : > { %v1625_v16 = vadd.f32 %v1571_v42, %v1368_v55  ;;  %v1689_v29 = vld [vmem:[#allocation2 + $0x88] sm:$0xff] (!%p1925_p6)  ;;  %1720 = vst [vmem:[%s2912_s27 + $0x80] sm:$0xff] (!%p1925_p6), %v1688_v62 }
 0x2c8   : > { %1656 = vst [vmem:[#allocation2 + $0xa0] sm:$0xff] %v1624_v45  ;;  %1721 = vst [vmem:[%s2912_s27 + $0x88] sm:$0xff] (!%p1925_p6), %v1689_v29 }
 0x2c9   : > { %1657 = vst [vmem:[#allocation2 + $0xa8] sm:$0xff] %v1625_v16  ;;  %v1575_v21 = vpop.f32.mrb[38].mxu1 }
 0x2ca   : > { %v1626_v18 = vadd.f32 %v1575_v21, %v1369_v6  ;;  %v1577_v47 = vpop.f32.mrb[39].mxu1 }
 0x2cb   : > { %v1627_v7 = vadd.f32 %v1577_v47, %v1370_v46  ;;  %v1690_v30 = vld [vmem:[#allocation2 + $0x90] sm:$0xff] (!%p1925_p6) }
 0x2cc   : > { %1658 = vst [vmem:[#allocation2 + $0xb0] sm:$0xff] %v1626_v18  ;;  %v1691_v11 = vld [vmem:[#allocation2 + $0x98] sm:$0xff] (!%p1925_p6)  ;;  %1722 = vst [vmem:[%s2912_s27 + $0x90] sm:$0xff] (!%p1925_p6), %v1690_v30 }
 0x2cd   : > { %1659 = vst [vmem:[#allocation2 + $0xb8] sm:$0xff] %v1627_v7  ;;  %v1581_v32 = vpop.f32.mrb[40].mxu1  ;;  %1723 = vst [vmem:[%s2912_s27 + $0x98] sm:$0xff] (!%p1925_p6), %v1691_v11 }
 0x2ce   : > { %v1628_v61 = vadd.f32 %v1581_v32, %v1371_v38  ;;  %v1583_v22 = vpop.f32.mrb[41].mxu1 }
 0x2cf   : > { %v1629_v54 = vadd.f32 %v1583_v22, %v1372_v50  ;;  %v1692_v37 = vld [vmem:[#allocation2 + $0xa0] sm:$0xff] (!%p1925_p6) }
 0x2d0   : > { %1660 = vst [vmem:[#allocation2 + $0xc0] sm:$0xff] %v1628_v61  ;;  %1724 = vst [vmem:[%s2912_s27 + $0xa0] sm:$0xff] (!%p1925_p6), %v1692_v37  ;;  %v1693_v33 = vld [vmem:[#allocation2 + $0xa8] sm:$0xff] (!%p1925_p6) }
 0x2d1   : > { %1661 = vst [vmem:[#allocation2 + $0xc8] sm:$0xff] %v1629_v54  ;;  %v1587_v59 = vpop.f32.mrb[42].mxu1  ;;  %1725 = vst [vmem:[%s2912_s27 + $0xa8] sm:$0xff] (!%p1925_p6), %v1693_v33 }
 0x2d2   : > { %v1630_v1 = vadd.f32 %v1587_v59, %v1373_v56  ;;  %v1589_v10 = vpop.f32.mrb[43].mxu1 }
 0x2d3   : > { %v1631_v36 = vadd.f32 %v1589_v10, %v1374_v34  ;;  %v1694_v39 = vld [vmem:[#allocation2 + $0xb0] sm:$0xff] (!%p1925_p6) }
 0x2d4   : > { %1662 = vst [vmem:[#allocation2 + $0xd0] sm:$0xff] %v1630_v1  ;;  %v1695_v13 = vld [vmem:[#allocation2 + $0xb8] sm:$0xff] (!%p1925_p6)  ;;  %1726 = vst [vmem:[%s2912_s27 + $0xb0] sm:$0xff] (!%p1925_p6), %v1694_v39 }
 0x2d5   : > { %1663 = vst [vmem:[#allocation2 + $0xd8] sm:$0xff] %v1631_v36  ;;  %v1593_v27 = vpop.f32.mrb[44].mxu1  ;;  %1727 = vst [vmem:[%s2912_s27 + $0xb8] sm:$0xff] (!%p1925_p6), %v1695_v13 }
 0x2d6   : > { %v1632_v0 = vadd.f32 %v1593_v27, %v1375_v60  ;;  %v1595_v2 = vpop.f32.mrb[45].mxu1 }
 0x2d7   : > { %v1633_v41 = vadd.f32 %v1595_v2, %v1376_v48  ;;  %1671 = sbr.rel (%p1925_p6) target bundleno = 742 (0x2e6), region = 90  ;;  %v1696_v24 = vld [vmem:[#allocation2 + $0xc0] sm:$0xff] (!%p1925_p6) }
 0x2d8   : > { %1664 = vst [vmem:[#allocation2 + $0xe0] sm:$0xff] %v1632_v0  ;;  %v1697_v49 = vld [vmem:[#allocation2 + $0xc8] sm:$0xff] (!%p1925_p6)  ;;  %1728 = vst [vmem:[%s2912_s27 + $0xc0] sm:$0xff] (!%p1925_p6), %v1696_v24 }
 0x2d9   : > { %1665 = vst [vmem:[#allocation2 + $0xe8] sm:$0xff] %v1633_v41  ;;  %v1599_v8 = vpop.f32.mrb[46].mxu1  ;;  %1729 = vst [vmem:[%s2912_s27 + $0xc8] sm:$0xff] (!%p1925_p6), %v1697_v49 }
 0x2da   : > { %v1634_v31 = vadd.f32 %v1599_v8, %v1377_v4  ;;  %v1601_v53 = vpop.f32.mrb[47].mxu1 }
 0x2db   : > { %v1635_v12 = vadd.f32 %v1601_v53, %v1378_v20  ;;  %v1698_v58 = vld [vmem:[#allocation2 + $0xd0] sm:$0xff] (!%p1925_p6) }
 0x2dc   : > { %1666 = vst [vmem:[#allocation2 + $0xf0] sm:$0xff] %v1634_v31  ;;  %1730 = vst [vmem:[%s2912_s27 + $0xd0] sm:$0xff] (!%p1925_p6), %v1698_v58  ;;  %v1699_v35 = vld [vmem:[#allocation2 + $0xd8] sm:$0xff] (!%p1925_p6) }
 0x2dd   : > { %1667 = vst [vmem:[#allocation2 + $0xf8] sm:$0xff] %v1635_v12  ;;  %1731 = vst [vmem:[%s2912_s27 + $0xd8] sm:$0xff] (!%p1925_p6), %v1699_v35 }
 0x2df   : > { %v1700_v51 = vld [vmem:[#allocation2 + $0xe0] sm:$0xff] }
 0x2e0   : > { %v1701_v55 = vld [vmem:[#allocation2 + $0xe8] sm:$0xff]  ;;  %1732 = vst [vmem:[%s2912_s27 + $0xe0] sm:$0xff] %v1700_v51 }
 0x2e1   : > { %1733 = vst [vmem:[%s2912_s27 + $0xe8] sm:$0xff] %v1701_v55 }
 0x2e3   : > { %v1702_v9 = vld [vmem:[#allocation2 + $0xf0] sm:$0xff] }
 0x2e4   : > { %v1703_v45 = vld [vmem:[#allocation2 + $0xf8] sm:$0xff]  ;;  %1734 = vst [vmem:[%s2912_s27 + $0xf0] sm:$0xff] %v1702_v9 }
 0x2e5   : > { %1735 = vst [vmem:[%s2912_s27 + $0xf8] sm:$0xff] %v1703_v45 }
 0x2e6 PF: > { %s1937_s1 = sshll.u32 %s2478_s21, 12  ;;  %s1751_s26 = sshll.u32 %s2912_s27, 4  ;;  %s3391_s26 = int_to_ptr.vmem [resolvable:$true] %s1751_s26 }
 0x2e7   : > { %s3388_s28 = scalar_lea.hbm %s3457_s4, %s1937_s1  ;;  %s3470_s30 = sand.u32 1, %s2458_s16  }
 0x2e8   : > { %s3395_s6 = scalar_lea.sflag [#allocation6], %s3470_s30  ;;  %s2380_s8 = scalar_lea.vmem %s3391_s26, 4096 }
 0x2e9   : > { %p2381_p7 = scmp.ne.s32.totalorder %s3391_s26, %s2380_s8  ;;  %s2493_s21 = smov [#allocation5]  }
 0x2ea   : > { %s2384_s12 = sshll.u32 %s2493_s21, 4  ;;  %s2385_s12 = int_to_ptr.vmem [resolvable:$false] %s2384_s12 }
 0x2eb   : > { %p2382_p8 = pnand %p2381_p7, %p2600_p10  ;;  %s2386_s13 = scalar_lea.vmem %s2385_s12, 8192 }
 0x2ec   : > { %p2387_p11 = scmp.lt.s32.totalorder %s3391_s26, %s2385_s12  ;;  %p2388_p13 = scmp.lt.s32.totalorder %s2386_s13, %s2380_s8 }
 0x2ed   : > { %p2383_p9 = pneg %p2382_p8 }
 0x2ee   : > { %p2389_p0 = por %p2388_p13, %p2387_p11 }
 0x2f0   : > { %p2390_p1 = pnand %p2389_p0, %p2383_p9 }
 0x2f2   : > { %2393 = shalt.err (!%p2390_p1)
}
 0x2f3   : > { %s2394_s27 = scalar_lea.hbm %s3388_s28, 4096  ;;  %s2398_s5 = scalar_lea.hbm %s3457_s4, 8192 }
 0x2f4   : > { %p2395_p2 = scmp.ne.s32.totalorder %s3388_s28, %s2394_s27  ;;  %p2399_p5 = scmp.lt.u32.totalorder %s3388_s28, %s3457_s4 }
 0x2f5   : > { %p2400_p6 = scmp.lt.u32.totalorder %s2398_s5, %s2394_s27  ;;  %p2402_p8 = scmp.lt.u32.totalorder %s2394_s27, %s3388_s28 }
 0x2f6   : > { %p2396_p3 = pnand %p2395_p2, %p2600_p10 }
 0x2f7   : > { %p2401_p7 = por %p2400_p6, %p2399_p5 }
 0x2f8   : > { %p2397_p4 = pneg %p2396_p3 }
 0x2f9   : > { %p2403_p9 = por %p2402_p8, %p2401_p7 }
 0x2fb   : > { %p2404_p11 = pnand %p2403_p9, %p2397_p4 }
 0x2fd   : > { %2407 = shalt.err (!%p2404_p11)
}
 0x2fe   : > { %s2494_s1 = smov 256   ;;  %s2495_s2 = smov 16  }
 0x2ff   : > { %2162 = dma.vmem_to_hbm [thread:$0]  (%p2600_p10), %s3391_s26, 4096, %s3388_s28, %s3395_s6, %s2494_s1, %s2494_s1, %s2495_s2  }
 0x300 PF: > { %p2168_p13 = scmp.ge.s32.totalorder %s2490_s24, 2  ;;  %s1766_s20 = sand.u32 1, %s2454_s15  }
 0x301   : > { %s1767_s30 = scalar_lea.sflag [#allocation6], %s1766_s20 }
 0x302   : > { %p2165_p0 = pnand %p2168_p13, %p2607_p12 }
 0x304   : > { %2449 = dma.done.wait (!%p2165_p0), %s1767_s30, 4096  }
 0x305   : > { %2451 = vsyncadd (!%p2165_p0), %s1767_s30, 4294963200  ;;  %s17_s24 = sadd.s32 1, %s2490_s24   ;;  %s3471_s9 = sld [smem:[#allocation8_spill]] }
 0x306   : > { %p14_p1 = scmp.ge.s32.totalorder %s17_s24, 10   ;;  %s3472_s28 = sld [smem:[#allocation9_spill]] }
 0x307   : > { %s3473_s15 = smov %s2458_s16  ;;  %s3474_s16 = smov %s2462_s17 }
 0x308   : > { %s3475_s17 = smov %s2605_s10  ;;  %s3476_s18 = smov %s2470_s19 }
 0x309   : > { %s3477_s19 = smov %s2594_s7  ;;  %s3478_s20 = smov %s2482_s22 }
 0x30a   : > { %s3479_s21 = smov %s2486_s23  ;;  %16 = sbr.rel (!%p14_p1) target bundleno = 9 (0x9), region = 144 }
 0x30b   : > { %s3480_s22 = smov %s3471_s9 }
 0x30c   : > { %s3481_s23 = smov %s3472_s28 }
 0x311   :  { %1772 = vsyncpa [#allocation6], 1 }
 0x312   :  { %1774 = vsyncpa [#allocation6 + $0x1], 1 }

</bundles_post_ra>
